<compile_context>
chip_gen: v6e
topology: v6e:2x2x1
jax: 0.10.0
libtpu: 0.0.40
codegen_flags: <defaults>
</compile_context>

<pallas_src>
import jax
import jax.numpy as jnp
from jax.experimental import pallas as pl
from jax.experimental.pallas import tpu as pltpu


# ---------------------------------------------------------------------------
# Pallas kernel: packed, fused MLP chain
#   xp    : (TR, in_dim*P)   packed input rows (P original rows per vreg row)
#   w0    : (in_dim*P, P*Hs) block-diag of ws0 (f32, VPU)   b0    : (1, P*Hs)
#   wmid  : (P*Hs, P*Ha)     block-diag of (ws1 @ wa0)      bmid  : (1, P*Ha)
#   wlast : (P*Ha, P*Gp)     block-diag of wa1 (G padded)   blast : (1, P*Gp)
#   out   : (TR, P*Gp)       lane-dense (128-wide) packed output
# ---------------------------------------------------------------------------
def multi_gaston_kernel(xp_ref, w0_ref, b0_ref, wmid_ref, bmid_ref,
                        wlast_ref, blast_ref, out_ref):
    xp = xp_ref[...]                                   # (TR, in_dim*P)
    n_in = xp.shape[1]                                 # static

    # --- f_S input layer ---
    if n_in <= 16:
        # Tiny contraction: VPU broadcast-FMAs (MXU stays free; block-diag
        # zeros are harmless filler).  Statically unrolled.
        h = b0_ref[...] + xp[:, 0:1] * w0_ref[0:1, :]
        for j in range(1, n_in):
            h = h + xp[:, j:j + 1] * w0_ref[j:j + 1, :]
    else:
        # Wide packed contraction: one cheap MXU push instead.
        h = jnp.dot(xp, w0_ref[...],
                    preferred_element_type=jnp.float32) + b0_ref[...]
    h = jnp.maximum(h, 0.0)                            # ReLU (f_S hidden)

    # --- fused (f_S last layer) @ (f_A first layer): one 128-wide MXU push ---
    a = jnp.dot(h.astype(wmid_ref.dtype), wmid_ref[...],
                preferred_element_type=jnp.float32) + bmid_ref[...]
    a = jnp.maximum(a, 0.0)                            # ReLU (f_A hidden)

    # --- f_A output layer: lane-dense (TR, P*Gp) result ---
    y = jnp.dot(a.astype(wlast_ref.dtype), wlast_ref[...],
                preferred_element_type=jnp.float32) + blast_ref[...]

    out_ref[...] = y.astype(out_ref.dtype)


# ---------------------------------------------------------------------------
# One-time weight preparation (runs eagerly once; the results are closed over
# by the jitted forward, so they become compile-time constants).
# ---------------------------------------------------------------------------
def _prepare_weights(params, compute_dtype):
    ws0, bs0 = params["ws0"], params["bs0"]
    ws1, bs1 = params["ws1"], params["bs1"]
    wa0, ba0 = params["wa0"], params["ba0"]
    wa1, ba1 = params["wa1"], params["ba1"]
    G = wa1.shape[1]

    # Pad G so the packed output row is a full 128 lanes (no masked vst.msk).
    if G >= 128:
        G_pad = -(-G // 128) * 128
        P = 1
    else:
        G_pad = 1
        while G_pad < G:
            G_pad *= 2                                  # divisor of 128
        P = 128 // G_pad
    if G_pad != G:
        wa1 = jnp.pad(wa1, ((0, 0), (0, G_pad - G)))
        ba1 = jnp.pad(ba1, ((0, 0), (0, G_pad - G)))

    # Algebraic fusion of f_S's last layer with f_A's first layer (there is no
    # activation between them in the module).
    w_mid = ws1 @ wa0                                   # (Hs, Ha)
    b_mid = bs1 @ wa0 + ba0                             # (1, Ha)

    eye = jnp.eye(P, dtype=jnp.float32)
    w0_bd = jnp.kron(eye, ws0)                          # f32 (VPU path)
    wmid_bd = jnp.kron(eye, w_mid).astype(compute_dtype)
    wlast_bd = jnp.kron(eye, wa1).astype(compute_dtype)
    b0_t = jnp.tile(bs0, (1, P))
    bmid_t = jnp.tile(b_mid, (1, P))
    blast_t = jnp.tile(ba1, (1, P))

    return dict(P=P, G=G, G_pad=G_pad,
                w0=w0_bd, b0=b0_t, wmid=wmid_bd, bmid=bmid_t,
                wlast=wlast_bd, blast=blast_t)


# ---------------------------------------------------------------------------
# Traced forward (called under jax.jit from the factory below).
# ---------------------------------------------------------------------------
def _forward_impl(x, prep, out_dtype):
    N, in_dim = x.shape
    P, G, G_pad = prep["P"], prep["G"], prep["G_pad"]
    out_itemsize = jnp.dtype(out_dtype).itemsize

    # Row-tiling unit: 16*P keeps packed tile rows a multiple of 16 (safe for
    # both f32 (8-sublane) and bf16 (16-sublane) blocks).
    unit = 16 * P
    N_pad = -(-N // unit) * unit
    if N_pad != N:
        x = jnp.pad(x, ((0, N_pad - N), (0, 0)))
    n_units = N_pad // unit

    # Cap the output tile at ~4 MiB per buffer (comfortably inside v5e's
    # 16 MiB scoped-VMEM default even when double-buffered).
    max_tile_rows = max(unit,
                        (((4 << 20) // (G_pad * out_itemsize)) // unit) * unit)

    # Few, large, and (when possible) an even number of grid steps: amortizes
    # per-step overhead on v5e/v6e and keeps the "parallel" axis shardable
    # across v7x's two TensorCores.
    if n_units >= 2 and n_units % 2 == 0:
        steps = 2
        while (N_pad // steps) > max_tile_rows and n_units % (steps * 2) == 0:
            steps *= 2
    else:
        steps = 1
    tile_n = N_pad // steps
    Np = N_pad // P                                     # packed rows, total
    TR = tile_n // P                                    # packed rows per tile

    # Bit-identical row-major repack of the input (pure reshape).
    xp = x.reshape(Np, in_dim * P)

    w0, b0 = prep["w0"], prep["b0"]
    wmid, bmid = prep["wmid"], prep["bmid"]
    wlast, blast = prep["wlast"], prep["blast"]

    full = lambda a: pl.BlockSpec(a.shape, lambda i: (0, 0))

    grid_spec = pltpu.PrefetchScalarGridSpec(
        num_scalar_prefetch=0,
        grid=(steps,),
        in_specs=[
            pl.BlockSpec((TR, in_dim * P), lambda i: (i, 0)),   # packed x tile
            full(w0), full(b0),
            full(wmid), full(bmid),
            full(wlast), full(blast),
        ],
        out_specs=pl.BlockSpec((TR, P * G_pad), lambda i: (i, 0)),
    )

    # Advisory cost estimate: memory-bound kernel.
    weight_bytes = sum(int(a.size) * a.dtype.itemsize
                       for a in (w0, b0, wmid, bmid, wlast, blast))
    flops = 2 * Np * (w0.size + wmid.size + wlast.size)
    bytes_accessed = (4 * N_pad * in_dim + out_itemsize * N_pad * G_pad
                      + weight_bytes)

    out_packed = pl.pallas_call(
        multi_gaston_kernel,
        out_shape=jax.ShapeDtypeStruct((Np, P * G_pad), out_dtype),
        grid_spec=grid_spec,
        compiler_params=pltpu.CompilerParams(
            dimension_semantics=("parallel",)),
        cost_estimate=pl.CostEstimate(
            flops=int(flops), transcendentals=0,
            bytes_accessed=int(bytes_accessed)),
    )(xp, w0, b0, wmid, bmid, wlast, blast)

    # Row-major unpack (pure reshape), then strip N / G padding.
    out = out_packed.reshape(N_pad, G_pad)
    return out[:N, :G]


# ---------------------------------------------------------------------------
# Factory: prepares weights once and returns a jitted forward  x -> (N, G).
#   compute_dtype: dtype of the two MXU matmul operands (bf16 = production).
#   out_dtype:     dtype of the kernel output written to HBM.
# ---------------------------------------------------------------------------
def make_multi_gaston(params, *, compute_dtype=jnp.bfloat16,
                      out_dtype=jnp.bfloat16):
    prep = _prepare_weights(params, compute_dtype)

    @jax.jit
    def forward(x):
        return _forward_impl(x, prep, out_dtype)

    return forward


# ---------------------------------------------------------------------------
# Deterministic parameter init (mimics nn.Linear's uniform(-1/sqrt(in), ...)).
# Weights stored as (in, out): transpose of PyTorch's (out, in) layout.
# TODO(synk): only the single-hidden-layer f_S / f_A configuration (as in the
#             example instantiation) is implemented; deeper hidden lists would
#             need extra fused layers in the kernel.
# ---------------------------------------------------------------------------
def init_params(key, in_dim, s_hidden, K, a_hidden, G):
    def linear(key, fan_in, fan_out):
        kw, kb = jax.random.split(key)
        bound = 1.0 / jnp.sqrt(fan_in)
        w = jax.random.uniform(kw, (fan_in, fan_out), jnp.float32, -bound, bound)
        b = jax.random.uniform(kb, (1, fan_out), jnp.float32, -bound, bound)
        return w, b

    k0, k1, k2, k3 = jax.random.split(key, 4)
    ws0, bs0 = linear(k0, in_dim, s_hidden)     # f_S layer 0
    ws1, bs1 = linear(k1, s_hidden, K)          # f_S layer 1
    wa0, ba0 = linear(k2, K, a_hidden)          # f_A layer 0
    wa1, ba1 = linear(k3, a_hidden, G)          # f_A layer 1
    return dict(ws0=ws0, bs0=bs0, ws1=ws1, bs1=bs1,
                wa0=wa0, ba0=ba0, wa1=wa1, ba1=ba1)


def reference_forward(x, p):
    """Unfused pure-JAX reference matching the PyTorch forward."""
    h = jnp.maximum(x @ p["ws0"] + p["bs0"], 0.0)
    z = h @ p["ws1"] + p["bs1"]
    a = jnp.maximum(z @ p["wa0"] + p["ba0"], 0.0)
    return a @ p["wa1"] + p["ba1"]


if __name__ == "__main__":
    # Shapes consistent with the module's forward:
    #   G=32 genes, S_hidden_list=[32], A_hidden_list=[32], K=4,
    #   pos_encoding=False -> input_size = 2.  N spatial points (small).
    N, IN_DIM = 1024, 2
    S_HIDDEN, K, A_HIDDEN, G = 32, 4, 32, 32

    key = jax.random.PRNGKey(0)
    kx, kp = jax.random.split(key)
    x = jax.random.normal(kx, (N, IN_DIM), jnp.float32)
    params = init_params(kp, IN_DIM, S_HIDDEN, K, A_HIDDEN, G)

    ref = reference_forward(x, params)

    # --- strict f32 validation path ---
    fwd_f32 = make_multi_gaston(params, compute_dtype=jnp.float32,
                                out_dtype=jnp.float32)
    out_f32 = jax.block_until_ready(fwd_f32(x))
    assert out_f32.shape == (N, G)
    err_f32 = float(jnp.max(jnp.abs(out_f32 - ref)))
    # ws1@wa0 fusion + MXU accumulation order differ from the reference only
    # at float-associativity level.
    assert err_f32 < 1e-4, f"f32 path mismatch: max abs err = {err_f32}"

    # --- production path: bf16 MXU operands + bf16 output ---
    fwd_prod = make_multi_gaston(params)          # bf16 compute / bf16 out
    out_prod = jax.block_until_ready(fwd_prod(x))
    assert out_prod.shape == (N, G)
    err = float(jnp.max(jnp.abs(out_prod.astype(jnp.float32) - ref)))
    scale = max(1.0, float(jnp.max(jnp.abs(ref))))
    assert err / scale < 5e-2, f"bf16 path mismatch: rel err = {err / scale}"

    print("KERNEL_OK")
</pallas_src>

<mosaic_0001>
module attributes {stable_mosaic.version = 11 : i64} {
  func.func @multi_gaston_kernel(%arg0: i32, %arg1: memref<128x8xf32, #tpu.memory_space<vmem>>, %arg2: memref<8x128xf32, #tpu.memory_space<vmem>>, %arg3: memref<1x128xf32, #tpu.memory_space<vmem>>, %arg4: memref<128x128xf32, #tpu.memory_space<vmem>>, %arg5: memref<1x128xf32, #tpu.memory_space<vmem>>, %arg6: memref<128x128xf32, #tpu.memory_space<vmem>>, %arg7: memref<1x128xf32, #tpu.memory_space<vmem>>, %arg8: memref<128x128xf32, #tpu.memory_space<vmem>>) attributes {dimension_semantics = [#tpu.dimension_semantics<parallel>], iteration_bounds = array<i64: 2>, scalar_prefetch = 0 : i64, scratch_operands = 0 : i64, tpu.core_type = #tpu.core_type<tc>, window_params = [{transform_indices = @transform_0, window_bounds = array<i64: 128, 8>}, {pipeline_mode = #tpu.pipeline_mode<synchronous>, transform_indices = @transform_1, window_bounds = array<i64: 8, 128>}, {pipeline_mode = #tpu.pipeline_mode<synchronous>, transform_indices = @transform_2, window_bounds = array<i64: 1, 128>}, {pipeline_mode = #tpu.pipeline_mode<synchronous>, transform_indices = @transform_3, window_bounds = array<i64: 128, 128>}, {pipeline_mode = #tpu.pipeline_mode<synchronous>, transform_indices = @transform_4, window_bounds = array<i64: 1, 128>}, {pipeline_mode = #tpu.pipeline_mode<synchronous>, transform_indices = @transform_5, window_bounds = array<i64: 128, 128>}, {pipeline_mode = #tpu.pipeline_mode<synchronous>, transform_indices = @transform_6, window_bounds = array<i64: 1, 128>}, {transform_indices = @transform_7, window_bounds = array<i64: 128, 128>}]} {
    %c0 = arith.constant 0 : index
    %c0_0 = arith.constant 0 : index
    %0 = vector.load %arg1[%c0, %c0_0] : memref<128x8xf32, #tpu.memory_space<vmem>>, vector<128x8xf32>
    %c0_1 = arith.constant 0 : index
    %c0_2 = arith.constant 0 : index
    %1 = vector.load %arg3[%c0_1, %c0_2] : memref<1x128xf32, #tpu.memory_space<vmem>>, vector<1x128xf32>
    %2 = vector.extract_strided_slice %0 {offsets = [0, 0], sizes = [128, 1], strides = [1, 1]} : vector<128x8xf32> to vector<128x1xf32>
    %c0_3 = arith.constant 0 : index
    %c0_4 = arith.constant 0 : index
    %3 = vector.load %arg2[%c0_3, %c0_4] : memref<8x128xf32, #tpu.memory_space<vmem>>, vector<1x128xf32>
    %4 = vector.broadcast %2 : vector<128x1xf32> to vector<128x128xf32>
    %5 = vector.broadcast %3 : vector<1x128xf32> to vector<128x128xf32>
    %6 = arith.mulf %4, %5 : vector<128x128xf32>
    %7 = vector.broadcast %1 : vector<1x128xf32> to vector<128x128xf32>
    %8 = arith.addf %7, %6 : vector<128x128xf32>
    %9 = vector.extract_strided_slice %0 {offsets = [0, 1], sizes = [128, 1], strides = [1, 1]} : vector<128x8xf32> to vector<128x1xf32>
    %c1 = arith.constant 1 : index
    %c0_5 = arith.constant 0 : index
    %10 = vector.load %arg2[%c1, %c0_5] : memref<8x128xf32, #tpu.memory_space<vmem>>, vector<1x128xf32>
    %11 = vector.broadcast %9 : vector<128x1xf32> to vector<128x128xf32>
    %12 = vector.broadcast %10 : vector<1x128xf32> to vector<128x128xf32>
    %13 = arith.mulf %11, %12 : vector<128x128xf32>
    %14 = arith.addf %8, %13 : vector<128x128xf32>
    %15 = vector.extract_strided_slice %0 {offsets = [0, 2], sizes = [128, 1], strides = [1, 1]} : vector<128x8xf32> to vector<128x1xf32>
    %c2 = arith.constant 2 : index
    %c0_6 = arith.constant 0 : index
    %16 = vector.load %arg2[%c2, %c0_6] : memref<8x128xf32, #tpu.memory_space<vmem>>, vector<1x128xf32>
    %17 = vector.broadcast %15 : vector<128x1xf32> to vector<128x128xf32>
    %18 = vector.broadcast %16 : vector<1x128xf32> to vector<128x128xf32>
    %19 = arith.mulf %17, %18 : vector<128x128xf32>
    %20 = arith.addf %14, %19 : vector<128x128xf32>
    %21 = vector.extract_strided_slice %0 {offsets = [0, 3], sizes = [128, 1], strides = [1, 1]} : vector<128x8xf32> to vector<128x1xf32>
    %c3 = arith.constant 3 : index
    %c0_7 = arith.constant 0 : index
    %22 = vector.load %arg2[%c3, %c0_7] : memref<8x128xf32, #tpu.memory_space<vmem>>, vector<1x128xf32>
    %23 = vector.broadcast %21 : vector<128x1xf32> to vector<128x128xf32>
    %24 = vector.broadcast %22 : vector<1x128xf32> to vector<128x128xf32>
    %25 = arith.mulf %23, %24 : vector<128x128xf32>
    %26 = arith.addf %20, %25 : vector<128x128xf32>
    %27 = vector.extract_strided_slice %0 {offsets = [0, 4], sizes = [128, 1], strides = [1, 1]} : vector<128x8xf32> to vector<128x1xf32>
    %c4 = arith.constant 4 : index
    %c0_8 = arith.constant 0 : index
    %28 = vector.load %arg2[%c4, %c0_8] : memref<8x128xf32, #tpu.memory_space<vmem>>, vector<1x128xf32>
    %29 = vector.broadcast %27 : vector<128x1xf32> to vector<128x128xf32>
    %30 = vector.broadcast %28 : vector<1x128xf32> to vector<128x128xf32>
    %31 = arith.mulf %29, %30 : vector<128x128xf32>
    %32 = arith.addf %26, %31 : vector<128x128xf32>
    %33 = vector.extract_strided_slice %0 {offsets = [0, 5], sizes = [128, 1], strides = [1, 1]} : vector<128x8xf32> to vector<128x1xf32>
    %c5 = arith.constant 5 : index
    %c0_9 = arith.constant 0 : index
    %34 = vector.load %arg2[%c5, %c0_9] : memref<8x128xf32, #tpu.memory_space<vmem>>, vector<1x128xf32>
    %35 = vector.broadcast %33 : vector<128x1xf32> to vector<128x128xf32>
    %36 = vector.broadcast %34 : vector<1x128xf32> to vector<128x128xf32>
    %37 = arith.mulf %35, %36 : vector<128x128xf32>
    %38 = arith.addf %32, %37 : vector<128x128xf32>
    %39 = vector.extract_strided_slice %0 {offsets = [0, 6], sizes = [128, 1], strides = [1, 1]} : vector<128x8xf32> to vector<128x1xf32>
    %c6 = arith.constant 6 : index
    %c0_10 = arith.constant 0 : index
    %40 = vector.load %arg2[%c6, %c0_10] : memref<8x128xf32, #tpu.memory_space<vmem>>, vector<1x128xf32>
    %41 = vector.broadcast %39 : vector<128x1xf32> to vector<128x128xf32>
    %42 = vector.broadcast %40 : vector<1x128xf32> to vector<128x128xf32>
    %43 = arith.mulf %41, %42 : vector<128x128xf32>
    %44 = arith.addf %38, %43 : vector<128x128xf32>
    %45 = vector.extract_strided_slice %0 {offsets = [0, 7], sizes = [128, 1], strides = [1, 1]} : vector<128x8xf32> to vector<128x1xf32>
    %c7 = arith.constant 7 : index
    %c0_11 = arith.constant 0 : index
    %46 = vector.load %arg2[%c7, %c0_11] : memref<8x128xf32, #tpu.memory_space<vmem>>, vector<1x128xf32>
    %47 = vector.broadcast %45 : vector<128x1xf32> to vector<128x128xf32>
    %48 = vector.broadcast %46 : vector<1x128xf32> to vector<128x128xf32>
    %49 = arith.mulf %47, %48 : vector<128x128xf32>
    %50 = arith.addf %44, %49 : vector<128x128xf32>
    %cst = arith.constant 0.000000e+00 : f32
    %51 = vector.broadcast %cst : f32 to vector<128x128xf32>
    %52 = arith.maximumf %50, %51 : vector<128x128xf32>
    %c0_12 = arith.constant 0 : index
    %c0_13 = arith.constant 0 : index
    %53 = vector.load %arg4[%c0_12, %c0_13] : memref<128x128xf32, #tpu.memory_space<vmem>>, vector<128x128xf32>
    %cst_14 = arith.constant dense<0.000000e+00> : vector<128x128xf32>
    %54 = tpu.matmul %52, %53, %cst_14 {dimension_numbers = #tpu.dot_dimension_numbers<[1], [0], [0], [1], [0, 0, 1, 1], [], []>} : vector<128x128xf32>, vector<128x128xf32>, vector<128x128xf32> -> vector<128x128xf32>
    %c0_15 = arith.constant 0 : index
    %c0_16 = arith.constant 0 : index
    %55 = vector.load %arg5[%c0_15, %c0_16] : memref<1x128xf32, #tpu.memory_space<vmem>>, vector<1x128xf32>
    %56 = vector.broadcast %55 : vector<1x128xf32> to vector<128x128xf32>
    %57 = arith.addf %54, %56 : vector<128x128xf32>
    %cst_17 = arith.constant 0.000000e+00 : f32
    %58 = vector.broadcast %cst_17 : f32 to vector<128x128xf32>
    %59 = arith.maximumf %57, %58 : vector<128x128xf32>
    %c0_18 = arith.constant 0 : index
    %c0_19 = arith.constant 0 : index
    %60 = vector.load %arg6[%c0_18, %c0_19] : memref<128x128xf32, #tpu.memory_space<vmem>>, vector<128x128xf32>
    %cst_20 = arith.constant dense<0.000000e+00> : vector<128x128xf32>
    %61 = tpu.matmul %59, %60, %cst_20 {dimension_numbers = #tpu.dot_dimension_numbers<[1], [0], [0], [1], [0, 0, 1, 1], [], []>} : vector<128x128xf32>, vector<128x128xf32>, vector<128x128xf32> -> vector<128x128xf32>
    %c0_21 = arith.constant 0 : index
    %c0_22 = arith.constant 0 : index
    %62 = vector.load %arg7[%c0_21, %c0_22] : memref<1x128xf32, #tpu.memory_space<vmem>>, vector<1x128xf32>
    %63 = vector.broadcast %62 : vector<1x128xf32> to vector<128x128xf32>
    %64 = arith.addf %61, %63 : vector<128x128xf32>
    %c0_23 = arith.constant 0 : index
    %c0_24 = arith.constant 0 : index
    %65 = vector.load %arg8[%c0_23, %c0_24] : memref<128x128xf32, #tpu.memory_space<vmem>>, vector<128x128xf32>
    tpu.vector_store %arg8[%c0_23, %c0_24], %64 {strides = array<i32>} : memref<128x128xf32, #tpu.memory_space<vmem>>, vector<128x128xf32>,
    return
  }
  func.func @transform_0(%arg0: i32) -> (i32, i32) {
    %c0_i32 = arith.constant 0 : i32
    %c0_i32_0 = arith.constant 0 : i32
    return %arg0, %c0_i32 : i32, i32
  }
  func.func @transform_1(%arg0: i32) -> (i32, i32) {
    %c0_i32 = arith.constant 0 : i32
    %c0_i32_0 = arith.constant 0 : i32
    %c0_i32_1 = arith.constant 0 : i32
    return %c0_i32, %c0_i32_0 : i32, i32
  }
  func.func @transform_2(%arg0: i32) -> (i32, i32) {
    %c0_i32 = arith.constant 0 : i32
    %c0_i32_0 = arith.constant 0 : i32
    %c0_i32_1 = arith.constant 0 : i32
    return %c0_i32, %c0_i32_0 : i32, i32
  }
  func.func @transform_3(%arg0: i32) -> (i32, i32) {
    %c0_i32 = arith.constant 0 : i32
    %c0_i32_0 = arith.constant 0 : i32
    %c0_i32_1 = arith.constant 0 : i32
    return %c0_i32, %c0_i32_0 : i32, i32
  }
  func.func @transform_4(%arg0: i32) -> (i32, i32) {
    %c0_i32 = arith.constant 0 : i32
    %c0_i32_0 = arith.constant 0 : i32
    %c0_i32_1 = arith.constant 0 : i32
    return %c0_i32, %c0_i32_0 : i32, i32
  }
  func.func @transform_5(%arg0: i32) -> (i32, i32) {
    %c0_i32 = arith.constant 0 : i32
    %c0_i32_0 = arith.constant 0 : i32
    %c0_i32_1 = arith.constant 0 : i32
    return %c0_i32, %c0_i32_0 : i32, i32
  }
  func.func @transform_6(%arg0: i32) -> (i32, i32) {
    %c0_i32 = arith.constant 0 : i32
    %c0_i32_0 = arith.constant 0 : i32
    %c0_i32_1 = arith.constant 0 : i32
    return %c0_i32, %c0_i32_0 : i32, i32
  }
  func.func @transform_7(%arg0: i32) -> (i32, i32) {
    %c0_i32 = arith.constant 0 : i32
    %c0_i32_0 = arith.constant 0 : i32
    return %arg0, %c0_i32 : i32, i32
  }
}

</mosaic_0001>

<bundles_post_ra>
// kernel: forward.1
= control target key start
LH: loop header
LB: loop body
LE: loop exit
PB: predicated region body
PF: predicated region fallthrough
CT: control target
= control target key end

     0   :  { %s1932_s24 = smov 0   ;;  %s2796_s0 = inlined_call_operand.vmem [shape: f32[256,8], index: 0, kind: input, shape index: {}]   ;;  %s2797_s1 = inlined_call_operand.vmem [shape: f32[8,128], index: 1, kind: input, shape index: {}]   ;;  %s2798_s2 = inlined_call_operand.vmem [shape: f32[1,128], index: 2, kind: input, shape index: {}]   ;;  %s2799_s3 = inlined_call_operand.vmem [shape: f32[128,128], index: 3, kind: input, shape index: {}]   ;;  %s2800_s4 = inlined_call_operand.vmem [shape: f32[1,128], index: 4, kind: input, shape index: {}]   ;;  %s2801_s5 = inlined_call_operand.vmem [shape: f32[128,128], index: 5, kind: input, shape index: {}]   ;;  %s2802_s6 = inlined_call_operand.vmem [shape: f32[1,128], index: 6, kind: input, shape index: {}]   ;;  %s2803_s7 = inlined_call_operand.vmem [shape: f32[256,128], index: 7, kind: output, shape index: {}]  }
   0x1 LB: > { %s1569_s25 = sadd.s32 4294967295, %s1882_s24   ;;  %p1573_p0 = scmp.ge.s32.totalorder %s1882_s24, 1  ;;  %s1882_s24 = sphi %s1932_s24, %s17_s24  }
   0x2   : > { %p238_p1 = scmp.lt.s32.totalorder %s1882_s24, 3 }
   0x4   : > { %p239_p2 = pnand %p1573_p0, %p238_p1 }
   0x6   : > { %242 = sbr.rel (%p239_p2) target bundleno = 948 (0x3b4), region = 48 }
   0xb   : > { %s1574_s26 = sshll.u32 %s1569_s25, 4  ;;  %v2812_v0 = vmov 1   ;;  %v2806_v1 = vmov 0   ;;  %v2818_v5 = vmov 2   ;;  %v2808_v8 = vmov 3   ;;  %v1160_v28 = vld [vmem:[%s2799_s3 + $0x78] sm:$0xff] }
   0xc   : > { %1784 = vset.pattern.permute.xlu1 %v2812_v0  ;;  %1783 = vset.pattern.permute.xlu0 %v2806_v1  ;;  %p271_p3 = scmp.lt.s32.totalorder %s1574_s26, 31  ;;  %v2804_v12 = vmov 6   ;;  %v2814_v17 = vmov 5   ;;  %v2810_v19 = vmov 4   ;;  %v2816_v20 = vmov 7   ;;  %v1159_v29 = vld [vmem:[%s2799_s3 + $0x70] sm:$0xff] }
   0xd   : > { %1655 = vmatprep.subr.mxu0 %v1160_v28  ;;  %v1158_v32 = vld [vmem:[%s2799_s3 + $0x68] sm:$0xff]  ;;  %v1157_v33 = vld [vmem:[%s2799_s3 + $0x60] sm:$0xff]  ;;  %v1156_v36 = vld [vmem:[%s2799_s3 + $0x58] sm:$0xff] }
   0xe   : > { %s2868_s26 = smov (!%p271_p3, %s1574_s26), 31  ;;  %1656 = vmatpush3.msra.mxu0 %v1160_v28  ;;  %v1155_v37 = vld [vmem:[%s2799_s3 + $0x50] sm:$0xff]  ;;  %v1154_v39 = vld [vmem:[%s2799_s3 + $0x48] sm:$0xff]  ;;  %v1153_v41 = vld [vmem:[%s2799_s3 + $0x40] sm:$0xff] }
   0xf   : > { %s1575_s27 = sshll.u32 %s2868_s26, 3  ;;  %1657 = vmatprep.subr.mxu0 %v1159_v29  ;;  %v1152_v43 = vld [vmem:[%s2799_s3 + $0x38] sm:$0xff]  ;;  %v1151_v45 = vld [vmem:[%s2799_s3 + $0x30] sm:$0xff]  ;;  %v1150_v47 = vld [vmem:[%s2799_s3 + $0x28] sm:$0xff] }
  0x10   : > { %s1950_s30 = scalar_lea.vmem %s2796_s0, %s1575_s27  ;;  %1658 = vmatpush3.msra.mxu0 %v1159_v29  ;;  %v1149_v48 = vld [vmem:[%s2799_s3 + $0x20] sm:$0xff]  ;;  %v1148_v51 = vld [vmem:[%s2799_s3 + $0x18] sm:$0xff]  ;;  %v1147_v52 = vld [vmem:[%s2799_s3 + $0x10] sm:$0xff]  ;;  %s2753_s19 = scalar_lea.vmem %s2803_s7, %s1575_s27 }
  0x11   : > { %v1953_v2 = vld [vmem:[%s1950_s30] sm:$0xff]  ;;  %v1958_v3 = vld [vmem:[%s1950_s30 + $0x8] sm:$0xff]  ;;  %v1963_v4 = vld [vmem:[%s1950_s30 + $0x10] sm:$0xff]  ;;  %1659 = vmatprep.subr.mxu0 %v1158_v32 }
  0x12   : > { %424 = vperm.xlu1 %1784, %v1953_v2   ;;  %302 = vperm.xlu0 %1783, %v1953_v2   ;;  %v1969_v6 = vld [vmem:[%s1950_s30 + $0x18] sm:$0xff]  ;;  %v1974_v7 = vld [vmem:[%s1950_s30 + $0x30] sm:$0xff]  ;;  %v1984_v10 = vld [vmem:[%s1950_s30 + $0x60] sm:$0xff] }
  0x13   : > { %v1979_v9 = vld [vmem:[%s1950_s30 + $0x58] sm:$0xff]  ;;  %v1990_v11 = vld [vmem:[%s1950_s30 + $0x20] sm:$0xff]  ;;  %v1997_v13 = vld [vmem:[%s1950_s30 + $0x28] sm:$0xff]  ;;  %1660 = vmatpush3.msra.mxu0 %v1158_v32 }
  0x14   : > { %v2006_v14 = vld [vmem:[%s1950_s30 + $0x38] sm:$0xff]  ;;  %v2013_v15 = vld [vmem:[%s1950_s30 + $0x40] sm:$0xff]  ;;  %v2018_v16 = vld [vmem:[%s1950_s30 + $0x68] sm:$0xff]  ;;  %1661 = vmatprep.subr.mxu0 %v1157_v33 }
  0x15   : > { %2823 = vst [vmem:[#allocation2_spill] sm:$0xff] %v2018_v16  ;;  %v2036_v18 = vld [vmem:[%s1950_s30 + $0x70] sm:$0xff]  ;;  %v2062_v21 = vld [vmem:[%s1950_s30 + $0x48] sm:$0xff]  ;;  %v2076_v23 = vld [vmem:[%s1950_s30 + $0x78] sm:$0xff]  ;;  %1662 = vmatpush3.msra.mxu0 %v1157_v33 }
  0x16   : > { %428 = vperm.xlu1 %1784, %v1958_v3   ;;  %307 = vperm.xlu0 %1783, %v1958_v3   ;;  %v2067_v22 = vld [vmem:[%s1950_s30 + $0x50] sm:$0xff]  ;;  %v1146_v55 = vld [vmem:[%s2799_s3 + $0x8] sm:$0xff]  ;;  %v1145_v56 = vld [vmem:[%s2799_s3] sm:$0xff] }
  0x17   : > { %2824 = vst [vmem:[#allocation3_spill] sm:$0xff] %v2067_v22  ;;  %1663 = vmatprep.subr.mxu0 %v1156_v36  ;;  %v2211_v63 = vld [vmem:[%s2797_s1] ss:$0 sm:$0xff]  ;;  %v2232_v29 = vld [vmem:[%s2797_s1 + $0x1] ss:$0 sm:$0xff] }
  0x18   : > { %1664 = vmatpush3.msra.mxu0 %v1156_v36 }
  0x19   : > { %1665 = vmatprep.subr.mxu0 %v1155_v37 }
  0x1a   : > { %1785 = vset.pattern.permute.xlu1 %v2818_v5  ;;  %312 = vperm.xlu0 %1783, %v1963_v4  }
  0x1b   : > { %525 = vperm.xlu1 %1785, %v1953_v2   ;;  %1666 = vmatpush3.msra.mxu0 %v1155_v37 }
  0x1c   : > { %1667 = vmatprep.subr.mxu0 %v1154_v39 }
  0x1d   : > { %1668 = vmatpush3.msra.mxu0 %v1154_v39 }
  0x1e   : > { %317 = vperm.xlu0 %1783, %v1969_v6   ;;  %1669 = vmatprep.subr.mxu0 %v1153_v41 }
  0x1f   : > { %529 = vperm.xlu1 %1785, %v1958_v3   ;;  %1670 = vmatpush3.msra.mxu0 %v1153_v41 }
  0x20   : > { %1671 = vmatprep.subr.mxu0 %v1152_v43 }
  0x21   : > { %1672 = vmatpush3.msra.mxu0 %v1152_v43 }
  0x22   : > { %332 = vperm.xlu0 %1783, %v1974_v7   ;;  %1673 = vmatprep.subr.mxu0 %v1151_v45 }
  0x23   : > { %1786 = vset.pattern.permute.xlu1 %v2808_v8  ;;  %1674 = vmatpush3.msra.mxu0 %v1151_v45 }
  0x24   : > { %626 = vperm.xlu1 %1786, %v1953_v2   ;;  %1675 = vmatprep.subr.mxu0 %v1150_v47 }
  0x25   : > { %1676 = vmatpush3.msra.mxu0 %v1150_v47 }
  0x26   : > { %357 = vperm.xlu0 %1783, %v1979_v9   ;;  %1677 = vmatprep.subr.mxu0 %v1149_v48 }
  0x27   : > { %1678 = vmatpush3.msra.mxu0 %v1149_v48 }
  0x28   : > { %1787 = vset.pattern.permute.xlu1 %v2812_v0  ;;  %1679 = vmatprep.subr.mxu0 %v1148_v51 }
  0x29   : > { %436 = vperm.xlu1 %1787, %v1969_v6   ;;  %1680 = vmatpush3.msra.mxu0 %v1148_v51 }
  0x2a   : > { %362 = vperm.xlu0 %1783, %v1984_v10   ;;  %1681 = vmatprep.subr.mxu0 %v1147_v52 }
  0x2b   : > { %1682 = vmatpush3.msra.mxu0 %v1147_v52 }
  0x2c   : > { %1683 = vmatprep.subr.mxu0 %v1146_v55 }
  0x2d   : > { %1788 = vset.pattern.permute.xlu1 %v2806_v1  ;;  %1684 = vmatpush3.msra.mxu0 %v1146_v55 }
  0x2e   : > { %322 = vperm.xlu1 %1788, %v1990_v11   ;;  %1828 = vset.pattern.permute.xlu0 %v2804_v12 }
  0x2f   : > { %929 = vperm.xlu0 %1828, %v1953_v2   ;;  %1685 = vmatprep.subr.mxu0 %v1145_v56 }
  0x30   : > { %1686 = vmatpush3.msra.mxu0 %v1145_v56 }
  0x32   : > { %1789 = vset.pattern.permute.xlu1 %v2818_v5 }
  0x33   : > { %533 = vperm.xlu1 %1789, %v1963_v4   ;;  %949 = vperm.xlu0 %1828, %v1997_v13  }
  0x37   : > { %1790 = vset.pattern.permute.xlu1 %v2806_v1  ;;  %953 = vperm.xlu0 %1828, %v1974_v7  }
  0x38   : > { %327 = vperm.xlu1 %1790, %v1997_v13  }
  0x3b   : > { %1831 = vset.pattern.permute.xlu0 %v2818_v5 }
  0x3c   : > { %1791 = vset.pattern.permute.xlu1 %v2818_v5  ;;  %553 = vperm.xlu0 %1831, %v2006_v14  }
  0x3d   : > { %537 = vperm.xlu1 %1791, %v1969_v6  }
  0x40   : > { %557 = vperm.xlu0 %1831, %v2013_v15  }
  0x41   : > { %1792 = vset.pattern.permute.xlu1 %v2812_v0 }
  0x42   : > { %440 = vperm.xlu1 %1792, %v1990_v11  }
  0x44   : > { %577 = vperm.xlu0 %1831, %v2018_v16  }
  0x46   : > { %1793 = vset.pattern.permute.xlu1 %v2814_v17 }
  0x47   : > { %828 = vperm.xlu1 %1793, %v1953_v2  }
  0x48   : > { %1844 = vset.pattern.permute.xlu0 %v2812_v0 }
  0x49   : > { %432 = vperm.xlu0 %1844, %v1963_v4  }
  0x4b   : > { %1794 = vset.pattern.permute.xlu1 %v2812_v0 }
  0x4c   : > { %444 = vperm.xlu1 %1794, %v1997_v13  }
  0x4d   : > { %452 = vperm.xlu0 %1844, %v2006_v14  }
  0x50   : > { %1795 = vset.pattern.permute.xlu1 %v2814_v17 }
  0x51   : > { %832 = vperm.xlu1 %1795, %v1958_v3   ;;  %456 = vperm.xlu0 %1844, %v2013_v15  }
  0x55   : > { %1796 = vset.pattern.permute.xlu1 %v2818_v5  ;;  %476 = vperm.xlu0 %1844, %v2018_v16  }
  0x56   : > { %541 = vperm.xlu1 %1796, %v1990_v11  }
  0x59   : > { %480 = vperm.xlu0 %1844, %v2036_v18  }
  0x5a   : > { %1797 = vset.pattern.permute.xlu1 %v2810_v19 }
  0x5b   : > { %735 = vperm.xlu1 %1797, %v1963_v4  }
  0x5d   : > { %1847 = vset.pattern.permute.xlu0 %v2814_v17 }
  0x5e   : > { %848 = vperm.xlu0 %1847, %v1997_v13  }
  0x5f   : > { %1798 = vset.pattern.permute.xlu1 %v2806_v1 }
  0x60   : > { %337 = vperm.xlu1 %1798, %v2006_v14  }
  0x62   : > { %852 = vperm.xlu0 %1847, %v1974_v7  }
  0x64   : > { %1799 = vset.pattern.permute.xlu1 %v2818_v5 }
  0x65   : > { %545 = vperm.xlu1 %1799, %v1997_v13  }
  0x66   : > { %872 = vperm.xlu0 %1847, %v1979_v9  }
  0x69   : > { %1800 = vset.pattern.permute.xlu1 %v2804_v12 }
  0x6a   : > { %933 = vperm.xlu1 %1800, %v1958_v3   ;;  %1852 = vset.pattern.permute.xlu0 %v2808_v8 }
  0x6b   : > { %630 = vperm.xlu0 %1852, %v1958_v3  }
  0x6e   : > { %1801 = vset.pattern.permute.xlu1 %v2812_v0 }
  0x6f   : > { %448 = vperm.xlu1 %1801, %v1974_v7   ;;  %634 = vperm.xlu0 %1852, %v1963_v4  }
  0x73   : > { %1802 = vset.pattern.permute.xlu1 %v2814_v17  ;;  %638 = vperm.xlu0 %1852, %v1969_v6  }
  0x74   : > { %836 = vperm.xlu1 %1802, %v1963_v4  }
  0x77   : > { %642 = vperm.xlu0 %1852, %v1990_v11  }
  0x78   : > { %1803 = vset.pattern.permute.xlu1 %v2816_v20 }
  0x79   : > { %1030 = vperm.xlu1 %1803, %v1953_v2  }
  0x7b   : > { %662 = vperm.xlu0 %1852, %v2062_v21  }
  0x7d   : > { %1804 = vset.pattern.permute.xlu1 %v2808_v8 }
  0x7e   : > { %646 = vperm.xlu1 %1804, %v1997_v13  }
  0x7f   : > { %666 = vperm.xlu0 %1852, %v2067_v22  }
  0x82   : > { %1805 = vset.pattern.permute.xlu1 %v2814_v17 }
  0x83   : > { %840 = vperm.xlu1 %1805, %v1969_v6   ;;  %682 = vperm.xlu0 %1852, %v2036_v18  }
  0x87   : > { %1806 = vset.pattern.permute.xlu1 %v2806_v1  ;;  %686 = vperm.xlu0 %1852, %v2076_v23  }
  0x88   : > { %342 = vperm.xlu1 %1806, %v2013_v15  }
  0x8b   : > { %1860 = vset.pattern.permute.xlu0 %v2810_v19 }
  0x8c   : > { %1807 = vset.pattern.permute.xlu1 %v2818_v5  ;;  %727 = vperm.xlu0 %1860, %v1953_v2  }
  0x8d   : > { %549 = vperm.xlu1 %1807, %v1974_v7   ;;  %v2085_v24 = vpop.permute.xlu1 %424  ;;  %v2087_v25 = vpop.permute.xlu0 %302 }
  0x90   : > { %731 = vperm.xlu0 %1860, %v1958_v3  }
  0x91   : > { %1808 = vset.pattern.permute.xlu1 %v2804_v12  ;;  %v2091_v26 = vpop.permute.xlu1 %428  ;;  %v2093_v27 = vpop.permute.xlu0 %307 }
  0x92   : > { %937 = vperm.xlu1 %1808, %v1963_v4  }
  0x94   : > { %739 = vperm.xlu0 %1860, %v1969_v6  }
  0x95   : > { %v2103_v30 = vpop.permute.xlu0 %312 }
  0x96   : > { %1809 = vset.pattern.permute.xlu1 %v2806_v1  ;;  %v2106_v31 = vpop.permute.xlu1 %525  ;;  %v386_v2 = vmul.f32 %v2211_v63, %v2103_v30 }
  0x97   : > { %347 = vperm.xlu1 %1809, %v2062_v21  }
  0x98   : > { %743 = vperm.xlu0 %1860, %v1990_v11  }
  0x99   : > { %v2116_v34 = vpop.permute.xlu0 %317 }
  0x9a   : > { %v2118_v35 = vpop.permute.xlu1 %529 }
  0x9b   : > { %1810 = vset.pattern.permute.xlu1 %v2810_v19 }
  0x9c   : > { %747 = vperm.xlu1 %1810, %v1997_v13   ;;  %763 = vperm.xlu0 %1860, %v2062_v21  }
  0x9d   : > { %v2129_v38 = vpop.permute.xlu0 %332 }
  0x9f   : > { %v2134_v40 = vpop.permute.xlu1 %626 }
  0xa0   : > { %1811 = vset.pattern.permute.xlu1 %v2804_v12  ;;  %767 = vperm.xlu0 %1860, %v2067_v22  }
  0xa1   : > { %941 = vperm.xlu1 %1811, %v1969_v6   ;;  %v2142_v42 = vpop.permute.xlu0 %357 }
  0xa2   : > { %2825 = vst [vmem:[#allocation4_spill] sm:$0xff] %v2142_v42 }
  0xa4   : > { %v2147_v44 = vpop.permute.xlu1 %436  ;;  %775 = vperm.xlu0 %1860, %v1984_v10  }
  0xa5   : > { %1812 = vset.pattern.permute.xlu1 %v2808_v8  ;;  %v2154_v46 = vpop.permute.xlu0 %362 }
  0xa6   : > { %2826 = vst [vmem:[#allocation5_spill] sm:$0xff] %v2154_v46  ;;  %650 = vperm.xlu1 %1812, %v1974_v7  }
  0xa8   : > { %779 = vperm.xlu0 %1860, %v2018_v16  }
  0xa9   : > { %v2164_v49 = vpop.permute.xlu1 %322 }
  0xaa   : > { %1813 = vset.pattern.permute.xlu1 %v2814_v17  ;;  %v2167_v50 = vpop.permute.xlu0 %929 }
  0xab   : > { %844 = vperm.xlu1 %1813, %v1990_v11  }
  0xac   : > { %787 = vperm.xlu0 %1860, %v2076_v23  }
  0xae   : > { %v2177_v53 = vpop.permute.xlu1 %533  ;;  %v2179_v54 = vpop.permute.xlu0 %949 }
  0xaf   : > { %1814 = vset.pattern.permute.xlu1 %v2812_v0 }
  0xb0   : > { %460 = vperm.xlu1 %1814, %v2062_v21   ;;  %1864 = vset.pattern.permute.xlu0 %v2816_v20 }
  0xb1   : > { %1034 = vperm.xlu0 %1864, %v1958_v3  }
  0xb2   : > { %v2191_v57 = vpop.permute.xlu0 %953 }
  0xb3   : > { %2827 = vst [vmem:[#allocation6_spill] sm:$0xff] %v2191_v57  ;;  %v2193_v58 = vpop.permute.xlu1 %327  ;;  %v2842_v57 = vmov 6  }
  0xb4   : > { %1815 = vset.pattern.permute.xlu1 %v2808_v8 }
  0xb5   : > { %654 = vperm.xlu1 %1815, %v2006_v14   ;;  %1038 = vperm.xlu0 %1864, %v1963_v4   ;;  %v2223_v4 = vld [vmem:[%s2798_s2] ss:$0 sm:$0xff] }
  0xb6   : > { %v408_v28 = vadd.f32 %v2223_v4, %v386_v2  ;;  %v2273_v2 = vld [vmem:[%s2797_s1 + $0x2] ss:$0 sm:$0xff] }
  0xb7   : > { %v554_v59 = vpop.permute.xlu0 %553 }
  0xb8   : > { %v2198_v60 = vpop.permute.xlu1 %537 }
  0xb9   : > { %1816 = vset.pattern.permute.xlu1 %v2816_v20  ;;  %1058 = vperm.xlu0 %1864, %v2006_v14  }
  0xba   : > { %1042 = vperm.xlu1 %1816, %v1969_v6  }
  0xbb   : > { %v2203_v61 = vpop.permute.xlu0 %557 }
  0xbd   : > { %v2205_v62 = vpop.permute.xlu1 %440  ;;  %1062 = vperm.xlu0 %1864, %v2013_v15  }
  0xbe   : > { %1817 = vset.pattern.permute.xlu1 %v2806_v1 }
  0xbf   : > { %352 = vperm.xlu1 %1817, %v2067_v22   ;;  %v2217_v3 = vpop.permute.xlu0 %577 }
  0xc0   : > { %2828 = vst [vmem:[#allocation7_spill] sm:$0xff] %v2217_v3  ;;  %v2328_v3 = vld [vmem:[%s2797_s1 + $0x3] ss:$0 sm:$0xff] }
  0xc1   : > { %1074 = vperm.xlu0 %1864, %v1979_v9  }
  0xc2   : > { %v2225_v6 = vpop.permute.xlu1 %828 }
  0xc3   : > { %1818 = vset.pattern.permute.xlu1 %v2810_v19 }
  0xc4   : > { %751 = vperm.xlu1 %1818, %v1974_v7   ;;  %v433_v30 = vpop.permute.xlu0 %432 }
  0xc5   : > { %v493_v32 = vmul.f32 %v2232_v29, %v433_v30  ;;  %1078 = vperm.xlu0 %1864, %v1984_v10   ;;  %v599_v30 = vmul.f32 %v2273_v2, %v554_v59 }
  0xc7   : > { %v2237_v33 = vadd.f32 %v493_v32, %v408_v28  ;;  %v2239_v36 = vpop.permute.xlu1 %444 }
  0xc8   : > { %1819 = vset.pattern.permute.xlu1 %v2804_v12  ;;  %v453_v37 = vpop.permute.xlu0 %452 }
  0xc9   : > { %945 = vperm.xlu1 %1819, %v1990_v11   ;;  %1867 = vset.pattern.permute.xlu0 %v2804_v12  ;;  %v498_v55 = vmul.f32 %v2232_v29, %v453_v37 }
  0xca   : > { %985 = vperm.xlu0 %1867, %v2036_v18  }
  0xcc   : > { %v2245_v39 = vpop.permute.xlu1 %832  ;;  %v2247_v41 = vpop.permute.xlu0 %456 }
  0xcd   : > { %1820 = vset.pattern.permute.xlu1 %v2818_v5 }
  0xce   : > { %561 = vperm.xlu1 %1820, %v2062_v21   ;;  %1870 = vset.pattern.permute.xlu0 %v2816_v20 }
  0xcf   : > { %1090 = vperm.xlu0 %1870, %v2076_v23  }
  0xd0   : > { %v2253_v43 = vpop.permute.xlu0 %476 }
  0xd1   : > { %2829 = vst [vmem:[#allocation8_spill] sm:$0xff] %v2253_v43  ;;  %v2255_v45 = vpop.permute.xlu1 %541  ;;  %v491_v43 = vmul.f32 %v2232_v29, %v2085_v24 }
  0xd2   : > { %1821 = vset.pattern.permute.xlu1 %v2810_v19 }
  0xd3   : > { %755 = vperm.xlu1 %1821, %v2006_v14  }
  0xd4   : > { %v2259_v47 = vpop.permute.xlu0 %480 }
  0xd5   : > { %2830 = vst [vmem:[#allocation9_spill] sm:$0xff] %v2259_v47 }
  0xd6   : > { %v2261_v48 = vpop.permute.xlu1 %735 }
  0xd7   : > { %1822 = vset.pattern.permute.xlu1 %v2812_v0 }
  0xd8   : > { %464 = vperm.xlu1 %1822, %v2067_v22  }
  0xd9   : > { %v2265_v51 = vpop.permute.xlu0 %848 }
  0xdb   : > { %v338_v52 = vpop.permute.xlu1 %337 }
  0xdc   : > { %v391_v56 = vmul.f32 %v2211_v63, %v338_v52  ;;  %1823 = vset.pattern.permute.xlu1 %v2808_v8 }
  0xdd   : > { %658 = vperm.xlu1 %1823, %v2013_v15   ;;  %v2276_v28 = vpop.permute.xlu0 %852 }
  0xde   : > { %2831 = vst [vmem:[#allocation10_spill] sm:$0xff] %v2276_v28  ;;  %v413_v32 = vadd.f32 %v2223_v4, %v391_v56 }
  0xe0   : > { %v514_v12 = vadd.f32 %v498_v55, %v413_v32  ;;  %v2280_v1 = vpop.permute.xlu1 %545 }
  0xe1   : > { %1824 = vset.pattern.permute.xlu1 %v2816_v20  ;;  %v2283_v37 = vpop.permute.xlu0 %872 }
  0xe2   : > { %2832 = vst [vmem:[#allocation11_spill] sm:$0xff] %v2283_v37  ;;  %1046 = vperm.xlu1 %1824, %v1990_v11   ;;  %v2286_v52 = vadd.f32 %v599_v30, %v514_v12 }
  0xe5   : > { %v2288_v8 = vpop.permute.xlu1 %933 }
  0xe6   : > { %1825 = vset.pattern.permute.xlu1 %v2812_v0  ;;  %v2291_v19 = vpop.permute.xlu0 %630 }
  0xe7   : > { %468 = vperm.xlu1 %1825, %v1979_v9  }
  0xea   : > { %v2294_v59 = vpop.permute.xlu1 %448  ;;  %v2296_v55 = vpop.permute.xlu0 %634 }
  0xeb   : > { %2833 = vst [vmem:[#allocation12_spill] sm:$0xff] %v2294_v59  ;;  %1826 = vset.pattern.permute.xlu1 %v2814_v17  ;;  %v2835_v17 = vmov 4  }
  0xec   : > { %856 = vperm.xlu1 %1826, %v2006_v14  }
  0xee   : > { %v2300_v56 = vpop.permute.xlu0 %638 }
  0xef   : > { %v2302_v11 = vpop.permute.xlu1 %836 }
  0xf0   : > { %1827 = vset.pattern.permute.xlu1 %v2816_v20  ;;  %v384_v20 = vmul.f32 %v2211_v63, %v2087_v25  ;;  %v592_v25 = vmul.f32 %v2273_v2, %v2106_v31  ;;  %v600_v31 = vmul.f32 %v2273_v2, %v2203_v61  ;;  %v2364_v61 = vld [vmem:[%s2797_s1 + $0x6] ss:$0 sm:$0xff] }
  0xf1   : > { %1050 = vperm.xlu1 %1827, %v1997_v13   ;;  %v996_v28 = vmul.f32 %v2364_v61, %v2167_v50  ;;  %v389_v50 = vmul.f32 %v2211_v63, %v2193_v58 }
  0xf2   : > { %v643_v12 = vpop.permute.xlu0 %642  ;;  %v406_v46 = vadd.f32 %v2223_v4, %v384_v20  ;;  %v693_v20 = vmul.f32 %v2328_v3, %v2134_v40  ;;  %v2354_v40 = vld [vmem:[%s2797_s1 + $0x4] ss:$0 sm:$0xff] }
  0xf4   : > { %v1031_v30 = vpop.permute.xlu1 %1030  ;;  %v507_v42 = vadd.f32 %v491_v43, %v406_v46  ;;  %v2349_v46 = vld [vmem:[%s2797_s1 + $0x5] ss:$0 sm:$0xff] }
  0xf5   : > { %1829 = vset.pattern.permute.xlu1 %v2818_v5  ;;  %v2838_v5 = vmov 0  }
  0xf6   : > { %565 = vperm.xlu1 %1829, %v2067_v22   ;;  %v2308_v32 = vpop.permute.xlu0 %662  ;;  %v608_v24 = vadd.f32 %v592_v25, %v507_v42 }
  0xf7   : > { %2834 = vst [vmem:[#allocation13_spill] sm:$0xff] %v2308_v32  ;;  %v2840_v32 = vmov 2  }
  0xf8   : > { %v709_v43 = vadd.f32 %v693_v20, %v608_v24 }
  0xf9   : > { %v2310_v0 = vpop.permute.xlu1 %646 }
  0xfa   : > { %1830 = vset.pattern.permute.xlu1 %v2835_v17  ;;  %v2313_v37 = vpop.permute.xlu0 %666 }
  0xfb   : > { %2836 = vst [vmem:[#allocation14_spill] sm:$0xff] %v2313_v37  ;;  %759 = vperm.xlu1 %1830, %v2013_v15  }
  0xfe   : > { %v2318_v13 = vpop.permute.xlu1 %840  ;;  %v2320_v47 = vpop.permute.xlu0 %682 }
  0xff   : > { %2837 = vst [vmem:[#allocation15_spill] sm:$0xff] %v2320_v47  ;;  %1832 = vset.pattern.permute.xlu1 %v2838_v5 }
 0x100   : > { %367 = vperm.xlu1 %1832, %v2018_v16   ;;  %v499_v16 = vmul.f32 %v2232_v29, %v2247_v41 }
 0x102   : > { %v2334_v37 = vpop.permute.xlu0 %686 }
 0x103   : > { %2839 = vst [vmem:[#allocation16_spill] sm:$0xff] %v2334_v37  ;;  %v343_v47 = vpop.permute.xlu1 %342 }
 0x104   : > { %v392_v22 = vmul.f32 %v2211_v63, %v343_v47  ;;  %1833 = vset.pattern.permute.xlu1 %v2840_v32 }
 0x105   : > { %569 = vperm.xlu1 %1833, %v1979_v9  }
 0x106   : > { %v414_v37 = vadd.f32 %v2223_v4, %v392_v22  ;;  %v388_v22 = vmul.f32 %v2211_v63, %v2164_v49  ;;  %v2377_v49 = vld [vmem:[%s2797_s1 + $0x7] ss:$0 sm:$0xff] }
 0x107   : > { %v728_v41 = vpop.permute.xlu0 %727 }
 0x108   : > { %v515_v47 = vadd.f32 %v499_v16, %v414_v37  ;;  %v794_v42 = vmul.f32 %v2354_v40, %v728_v41  ;;  %v2357_v25 = vpop.permute.xlu1 %549  ;;  %v895_v16 = vmul.f32 %v2349_v46, %v2225_v6  ;;  %v495_v41 = vmul.f32 %v2232_v29, %v2205_v62 }
 0x109   : > { %2841 = vst [vmem:[#allocation17_spill] sm:$0xff] %v2357_v25  ;;  %1834 = vset.pattern.permute.xlu1 %v2842_v57  ;;  %v410_v6 = vadd.f32 %v2223_v4, %v388_v22  ;;  %v411_v22 = vadd.f32 %v2223_v4, %v389_v50 }
 0x10a   : > { %v810_v37 = vadd.f32 %v794_v42, %v709_v43  ;;  %957 = vperm.xlu1 %1834, %v2006_v14   ;;  %v2372_v20 = vadd.f32 %v600_v31, %v515_v47  ;;  %v596_v14 = vmul.f32 %v2273_v2, %v2255_v45  ;;  %v1097_v31 = vmul.f32 %v2377_v49, %v1031_v30 }
 0x10b   : > { %v732_v24 = vpop.permute.xlu0 %731  ;;  %v2844_v43 = vmov 1   ;;  %v496_v42 = vmul.f32 %v2232_v29, %v2239_v36  ;;  %v511_v58 = vadd.f32 %v495_v41, %v410_v6  ;;  %v597_v45 = vmul.f32 %v2273_v2, %v2280_v1 }
 0x10c   : > { %2843 = vst [vmem:[#allocation18_spill] sm:$0xff] %v2372_v20  ;;  %v911_v17 = vadd.f32 %v895_v16, %v810_v37  ;;  %v697_v16 = vmul.f32 %v2328_v3, %v643_v12  ;;  %v698_v41 = vmul.f32 %v2328_v3, %v2310_v0  ;;  %v385_v1 = vmul.f32 %v2211_v63, %v2093_v27 }
 0x10d   : > { %v2383_v25 = vpop.permute.xlu1 %937  ;;  %v612_v20 = vadd.f32 %v596_v14, %v511_v58 }
 0x10e   : > { %1835 = vset.pattern.permute.xlu1 %v2844_v43  ;;  %v1012_v47 = vadd.f32 %v996_v28, %v911_v17  ;;  %v512_v28 = vadd.f32 %v496_v42, %v411_v22  ;;  %v2845_v43 = vmov 5   ;;  %v2846_v42 = vmov 7  }
 0x10f   : > { %472 = vperm.xlu1 %1835, %v1984_v10   ;;  %v2393_v62 = vpop.permute.xlu0 %739  ;;  %v713_v59 = vadd.f32 %v697_v16, %v612_v20  ;;  %v900_v20 = vmul.f32 %v2349_v46, %v2265_v51  ;;  %v407_v16 = vadd.f32 %v2223_v4, %v385_v1  ;;  %v492_v51 = vmul.f32 %v2232_v29, %v2091_v26 }
 0x110   : > { %v1113_v37 = vadd.f32 %v1097_v31, %v1012_v47  ;;  %v613_v50 = vadd.f32 %v597_v45, %v512_v28  ;;  %v593_v45 = vmul.f32 %v2273_v2, %v2118_v35  ;;  %v694_v28 = vmul.f32 %v2328_v3, %v2291_v19 }
 0x111   : > { %v387_v26 = vmul.f32 %v2211_v63, %v2116_v34  ;;  %v594_v35 = vmul.f32 %v2273_v2, %v2177_v53  ;;  %v494_v34 = vmul.f32 %v2232_v29, %v2147_v44  ;;  %v896_v53 = vmul.f32 %v2349_v46, %v2245_v39 }
 0x112   : > { %v2399_v30 = vpop.permute.xlu1 %347  ;;  %v1129_v17 = vmax.f32 %v1113_v37, 0.0  ;;  %v714_v47 = vadd.f32 %v698_v41, %v613_v50  ;;  %v997_v39 = vmul.f32 %v2364_v61, %v2288_v8 }
 0x113   : > { %1836 = vset.pattern.permute.xlu1 %v2845_v43  ;;  %v744_v36 = vpop.permute.xlu0 %743 }
 0x114   : > { %v798_v12 = vmul.f32 %v2354_v40, %v744_v36  ;;  %860 = vperm.xlu1 %1836, %v2013_v15   ;;  %1687 = vmatprep.mubr.f32.mxu0 %v1129_v17  ;;  %v2847_v17 = vmov 3  }
 0x116   : > { %v2406_v6 = vadd.f32 %v798_v12, %v713_v59  ;;  %v1001_v59 = vmul.f32 %v2364_v61, %v2179_v54  ;;  %v508_v54 = vadd.f32 %v492_v51, %v407_v16  ;;  %v795_v12 = vmul.f32 %v2354_v40, %v732_v24 }
 0x117   : > { %v748_v14 = vpop.permute.xlu1 %747  ;;  %v2410_v31 = vpop.permute.xlu0 %763  ;;  %v610_v24 = vadd.f32 %v594_v35, %v2237_v33  ;;  %v796_v33 = vmul.f32 %v2354_v40, %v2261_v48 }
 0x118   : > { %v799_v0 = vmul.f32 %v2354_v40, %v748_v14  ;;  %1837 = vset.pattern.permute.xlu1 %v2846_v42  ;;  %v609_v41 = vadd.f32 %v593_v45, %v508_v54  ;;  %v695_v14 = vmul.f32 %v2328_v3, %v2296_v55  ;;  %v897_v45 = vmul.f32 %v2349_v46, %v2302_v11 }
 0x119   : > { %1054 = vperm.xlu1 %1837, %v1974_v7  }
 0x11a   : > { %v815_v58 = vadd.f32 %v799_v0, %v714_v47  ;;  %v710_v1 = vadd.f32 %v694_v28, %v609_v41  ;;  %v409_v47 = vadd.f32 %v2223_v4, %v387_v26  ;;  %v998_v41 = vmul.f32 %v2364_v61, %v2383_v25 }
 0x11b   : > { %v2420_v27 = vpop.permute.xlu0 %767  ;;  %v898_v25 = vmul.f32 %v2349_v46, %v2318_v13 }
 0x11c   : > { %v916_v37 = vadd.f32 %v900_v20, %v815_v58  ;;  %v942_v22 = vpop.permute.xlu1 %941  ;;  %v811_v20 = vadd.f32 %v795_v12, %v710_v1  ;;  %v595_v58 = vmul.f32 %v2273_v2, %v2198_v60  ;;  %v510_v44 = vadd.f32 %v494_v34, %v409_v47 }
 0x11d   : > { %1838 = vset.pattern.permute.xlu1 %v2847_v17  ;;  %v797_v60 = vmul.f32 %v2354_v40, %v2393_v62  ;;  %v999_v34 = vmul.f32 %v2364_v61, %v942_v22 }
 0x11e   : > { %670 = vperm.xlu1 %1838, %v1979_v9   ;;  %v2428_v7 = vadd.f32 %v1001_v59, %v916_v37  ;;  %v711_v59 = vadd.f32 %v695_v14, %v610_v24  ;;  %v912_v16 = vadd.f32 %v896_v53, %v811_v20  ;;  %v696_v37 = vmul.f32 %v2328_v3, %v2300_v56 }
 0x11f   : > { %v2432_v36 = vpop.permute.xlu0 %775  ;;  %v611_v28 = vadd.f32 %v595_v58, %v510_v44  ;;  %v390_v58 = vmul.f32 %v2211_v63, %v2129_v38 }
 0x120   : > { %v812_v51 = vadd.f32 %v796_v33, %v711_v59  ;;  %v1013_v12 = vadd.f32 %v997_v39, %v912_v16 }
 0x121   : > { %v2435_v50 = vpop.permute.xlu1 %650  ;;  %v712_v8 = vadd.f32 %v696_v37, %v611_v28 }
 0x122   : > { %1839 = vset.pattern.permute.xlu1 %v2845_v43  ;;  %v913_v26 = vadd.f32 %v897_v45, %v812_v51  ;;  %v2849_v51 = vld [vmem:[#allocation17_spill] sm:$0xff] }
 0x123   : > { %864 = vperm.xlu1 %1839, %v2062_v21   ;;  %v2445_v19 = vpop.permute.xlu0 %779  ;;  %v813_v11 = vadd.f32 %v797_v60, %v712_v8  ;;  %v598_v38 = vmul.f32 %v2273_v2, %v2849_v51  ;;  %v2850_v60 = vmov 4  }
 0x124   : > { %v1014_v24 = vadd.f32 %v998_v41, %v913_v26 }
 0x125   : > { %v914_v33 = vadd.f32 %v898_v25, %v813_v11  ;;  %v2852_v11 = vld [vmem:[#allocation6_spill] sm:$0xff] }
 0x126   : > { %v2451_v0 = vpop.permute.xlu1 %844 }
 0x127   : > { %1840 = vset.pattern.permute.xlu1 %v2838_v5  ;;  %v2456_v55 = vpop.permute.xlu0 %787  ;;  %v1015_v37 = vadd.f32 %v999_v34, %v914_v33  ;;  %v2853_v34 = vld [vmem:[#allocation13_spill] sm:$0xff] }
 0x128   : > { %372 = vperm.xlu1 %1840, %v2036_v18  }
 0x12b   : > { %v461_v54 = vpop.permute.xlu1 %460 }
 0x12c   : > { %1841 = vset.pattern.permute.xlu1 %v2840_v32  ;;  %v1035_v48 = vpop.permute.xlu0 %1034 }
 0x12d   : > { %v1098_v56 = vmul.f32 %v2377_v49, %v1035_v48  ;;  %573 = vperm.xlu1 %1841, %v1984_v10  }
 0x12f   : > { %v1114_v35 = vadd.f32 %v1098_v56, %v1013_v12  ;;  %v2851_v56 = vld [vmem:[#allocation10_spill] sm:$0xff] }
 0x130   : > { %v655_v1 = vpop.permute.xlu1 %654  ;;  %v1039_v14 = vpop.permute.xlu0 %1038  ;;  %v901_v8 = vmul.f32 %v2349_v46, %v2851_v56  ;;  %v2858_v56 = vld [vmem:[#allocation4_spill] sm:$0xff] }
 0x131   : > { %v1130_v20 = vmax.f32 %v1114_v35, 0.0  ;;  %v700_v62 = vmul.f32 %v2328_v3, %v655_v1  ;;  %v1099_v47 = vmul.f32 %v2377_v49, %v1039_v14  ;;  %1842 = vset.pattern.permute.xlu1 %v2842_v57  ;;  %v1002_v1 = vmul.f32 %v2364_v61, %v2852_v11 }
 0x132   : > { %961 = vperm.xlu1 %1842, %v2013_v15   ;;  %v412_v15 = vadd.f32 %v2223_v4, %v390_v58 }
 0x133   : > { %v2484_v53 = vadd.f32 %v700_v62, %v2286_v52  ;;  %v1115_v59 = vadd.f32 %v1099_v47, %v1014_v24  ;;  %1688 = vmatmul.mubr.f32.vlgmr.msra.gmra.mxu0 %v1130_v20  ;;  %v2848_v52 = vld [vmem:[#allocation12_spill] sm:$0xff]  ;;  %v500_v20 = vmul.f32 %v2232_v29, %v461_v54  ;;  %v803_v54 = vmul.f32 %v2354_v40, %v2410_v31  ;;  %v2856_v31 = vld [vmem:[#allocation2_spill] sm:$0xff] }
 0x134   : > { %v497_v13 = vmul.f32 %v2232_v29, %v2848_v52 }
 0x135   : > { %v1131_v16 = vmax.f32 %v1115_v59, 0.0  ;;  %v1043_v44 = vpop.permute.xlu1 %1042  ;;  %v702_v59 = vmul.f32 %v2328_v3, %v2853_v34 }
 0x136   : > { %v1100_v39 = vmul.f32 %v2377_v49, %v1043_v44  ;;  %1843 = vset.pattern.permute.xlu1 %v2838_v5  ;;  %v513_v48 = vadd.f32 %v497_v13, %v412_v15  ;;  %v699_v5 = vmul.f32 %v2328_v3, %v2435_v50 }
 0x137   : > { %377 = vperm.xlu1 %1843, %v2076_v23   ;;  %1690 = vmatprep.mubr.f32.mxu0 %v1131_v16 }
 0x138   : > { %v1116_v22 = vadd.f32 %v1100_v39, %v1015_v37  ;;  %v614_v41 = vadd.f32 %v598_v38, %v513_v48  ;;  %v2855_v37 = vmov 1   ;;  %v899_v38 = vmul.f32 %v2349_v46, %v2451_v0  ;;  %v1343_v0 = vld [vmem:[%s2801_s5 + $0x70] sm:$0xff] }
 0x13a   : > { %v1132_v45 = vmax.f32 %v1116_v22, 0.0  ;;  %v353_v28 = vpop.permute.xlu1 %352  ;;  %v715_v26 = vadd.f32 %v699_v5, %v614_v41  ;;  %v2857_v5 = vld [vmem:[#allocation18_spill] sm:$0xff] }
 0x13b   : > { %1845 = vset.pattern.permute.xlu1 %v2850_v60  ;;  %v394_v39 = vmul.f32 %v2211_v63, %v353_v28 }
 0x13c   : > { %771 = vperm.xlu1 %1845, %v1979_v9   ;;  %1691 = vmatmul.mubr.f32.gmra.mxu0 %v1132_v45  ;;  %v393_v9 = vmul.f32 %v2211_v63, %v2399_v30  ;;  %v2854_v30 = vld [vmem:[#allocation3_spill] sm:$0xff] }
 0x13d   : > { %v416_v13 = vadd.f32 %v2223_v4, %v394_v39  ;;  %v1333_v39 = vld [vmem:[%s2801_s5 + $0x20] sm:$0xff] }
 0x13e   : > { %v415_v47 = vadd.f32 %v2223_v4, %v393_v9 }
 0x13f   : > { %v752_v12 = vpop.permute.xlu1 %751 }
 0x140   : > { %v800_v35 = vmul.f32 %v2354_v40, %v752_v12  ;;  %1846 = vset.pattern.permute.xlu1 %v2842_v57  ;;  %v516_v58 = vadd.f32 %v500_v20, %v415_v47  ;;  %v915_v12 = vadd.f32 %v899_v38, %v2406_v6 }
 0x141   : > { %965 = vperm.xlu1 %1846, %v2062_v21  }
 0x142   : > { %v816_v14 = vadd.f32 %v800_v35, %v715_v26 }
 0x144   : > { %v917_v50 = vadd.f32 %v901_v8, %v816_v14  ;;  %v946_v24 = vpop.permute.xlu1 %945  ;;  %v395_v8 = vmul.f32 %v2211_v63, %v2858_v56 }
 0x145   : > { %1848 = vset.pattern.permute.xlu1 %v2847_v17  ;;  %v1000_v48 = vmul.f32 %v2364_v61, %v946_v24  ;;  %v1340_v24 = vld [vmem:[%s2801_s5 + $0x58] sm:$0xff] }
 0x146   : > { %674 = vperm.xlu1 %1848, %v1984_v10   ;;  %v2512_v62 = vadd.f32 %v1002_v1, %v917_v50  ;;  %v1341_v1 = vld [vmem:[%s2801_s5 + $0x60] sm:$0xff]  ;;  %v417_v14 = vadd.f32 %v2223_v4, %v395_v8  ;;  %v2860_v8 = vld [vmem:[#allocation8_spill] sm:$0xff] }
 0x147   : > { %v1016_v35 = vadd.f32 %v1000_v48, %v915_v12 }
 0x149   : > { %v562_v25 = vpop.permute.xlu1 %561 }
 0x14a   : > { %v601_v33 = vmul.f32 %v2273_v2, %v562_v25  ;;  %1849 = vset.pattern.permute.xlu1 %v2845_v43  ;;  %v1338_v25 = vld [vmem:[%s2801_s5 + $0x48] sm:$0xff] }
 0x14b   : > { %868 = vperm.xlu1 %1849, %v2854_v30  }
 0x14c   : > { %v617_v16 = vadd.f32 %v601_v33, %v516_v58  ;;  %v1336_v58 = vld [vmem:[%s2801_s5 + $0x38] sm:$0xff] }
 0x14e   : > { %v718_v10 = vadd.f32 %v702_v59, %v617_v16  ;;  %v2522_v44 = vpop.permute.xlu1 %755  ;;  %v1337_v59 = vld [vmem:[%s2801_s5 + $0x40] sm:$0xff]  ;;  %v1871_v16 = vld [vmem:[%s1950_s30 + $0x58] sm:$0xff] }
 0x14f   : > { %1850 = vset.pattern.permute.xlu1 %v2855_v37 }
 0x150   : > { %484 = vperm.xlu1 %1850, %v2076_v23   ;;  %v2527_v15 = vadd.f32 %v803_v54, %v718_v10  ;;  %v1334_v10 = vld [vmem:[%s2801_s5 + $0x28] sm:$0xff] }
 0x153   : > { %v465_v52 = vpop.permute.xlu1 %464 }
 0x154   : > { %v501_v22 = vmul.f32 %v2232_v29, %v465_v52  ;;  %1851 = vset.pattern.permute.xlu1 %v2847_v17  ;;  %v1344_v17 = vld [vmem:[%s2801_s5 + $0x78] sm:$0xff] }
 0x155   : > { %678 = vperm.xlu1 %1851, %v2856_v31   ;;  %1711 = vmatprep.subr.mxu1 %v1344_v17 }
 0x156   : > { %v2533_v51 = vadd.f32 %v501_v22, %v416_v13  ;;  %1712 = vmatpush3.msra.mxu1 %v1344_v17  ;;  %v2859_v22 = vld [vmem:[#allocation14_spill] sm:$0xff]  ;;  %v1331_v17 = vld [vmem:[%s2801_s5 + $0x10] sm:$0xff] }
 0x157   : > { %1713 = vmatprep.subr.mxu1 %v1343_v0  ;;  %v703_v31 = vmul.f32 %v2328_v3, %v2859_v22 }
 0x158   : > { %v659_v45 = vpop.permute.xlu1 %658  ;;  %1714 = vmatpush3.msra.mxu1 %v1343_v0  ;;  %v1330_v0 = vld [vmem:[%s2801_s5 + $0x8] sm:$0xff] }
 0x159   : > { %v701_v28 = vmul.f32 %v2328_v3, %v659_v45  ;;  %1853 = vset.pattern.permute.xlu1 %v2846_v42  ;;  %v1872_v45 = vld [vmem:[%s1950_s30 + $0x60] sm:$0xff] }
 0x15a   : > { %1066 = vperm.xlu1 %1853, %v2062_v21   ;;  %v1342_v21 = vld [vmem:[%s2801_s5 + $0x68] sm:$0xff] }
 0x15b   : > { %v2545_v41 = vadd.f32 %v701_v28, %v2857_v5  ;;  %1715 = vmatprep.subr.mxu1 %v1342_v21  ;;  %v804_v28 = vmul.f32 %v2354_v40, %v2420_v27 }
 0x15c   : > { %1716 = vmatpush3.msra.mxu1 %v1342_v21 }
 0x15d   : > { %v1047_v26 = vpop.permute.xlu1 %1046  ;;  %1717 = vmatprep.subr.mxu1 %v1341_v1 }
 0x15e   : > { %v1101_v11 = vmul.f32 %v2377_v49, %v1047_v26  ;;  %1854 = vset.pattern.permute.xlu1 %v2840_v32  ;;  %1718 = vmatpush3.msra.mxu1 %v1341_v1  ;;  %v504_v26 = vmul.f32 %v2232_v29, %v2860_v8 }
 0x15f   : > { %581 = vperm.xlu1 %1854, %v2036_v18   ;;  %1719 = vmatprep.subr.mxu1 %v1340_v24  ;;  %v1339_v18 = vld [vmem:[%s2801_s5 + $0x50] sm:$0xff] }
 0x160   : > { %v1117_v6 = vadd.f32 %v1101_v11, %v1016_v35  ;;  %1720 = vmatpush3.msra.mxu1 %v1340_v24  ;;  %v2861_v35 = vld [vmem:[#allocation7_spill] sm:$0xff] }
 0x161   : > { %1721 = vmatprep.subr.mxu1 %v1339_v18  ;;  %v605_v11 = vmul.f32 %v2273_v2, %v2861_v35 }
 0x162   : > { %v1133_v9 = vmax.f32 %v1117_v6, 0.0  ;;  %v469_v50 = vpop.permute.xlu1 %468  ;;  %1722 = vmatpush3.msra.mxu1 %v1339_v18 }
 0x163   : > { %v502_v20 = vmul.f32 %v2232_v29, %v469_v50  ;;  %1855 = vset.pattern.permute.xlu1 %v2842_v57  ;;  %1723 = vmatprep.subr.mxu1 %v1338_v25  ;;  %v1874_v50 = vld [vmem:[%s1950_s30 + $0x70] sm:$0xff] }
 0x164   : > { %969 = vperm.xlu1 %1855, %v2854_v30   ;;  %1693 = vmatprep.mubr.f32.mxu0 %v1133_v9 }
 0x165   : > { %v2572_v47 = vadd.f32 %v502_v20, %v417_v14  ;;  %1724 = vmatpush3.msra.mxu1 %v1338_v25  ;;  %v2862_v25 = vld [vmem:[#allocation5_spill] sm:$0xff] }
 0x166   : > { %1725 = vmatprep.subr.mxu1 %v1337_v59 }
 0x167   : > { %v2577_v34 = vpop.permute.xlu1 %856  ;;  %1726 = vmatpush3.msra.mxu1 %v1337_v59  ;;  %v396_v59 = vmul.f32 %v2211_v63, %v2862_v25 }
 0x168   : > { %1856 = vset.pattern.permute.xlu1 %v2840_v32  ;;  %1727 = vmatprep.subr.mxu1 %v1336_v58  ;;  %v1335_v32 = vld [vmem:[%s2801_s5 + $0x30] sm:$0xff] }
 0x169   : > { %585 = vperm.xlu1 %1856, %v2076_v23   ;;  %1728 = vmatpush3.msra.mxu1 %v1336_v58  ;;  %v801_v58 = vmul.f32 %v2354_v40, %v2522_v44 }
 0x16a   : > { %1729 = vmatprep.subr.mxu1 %v1335_v32 }
 0x16b   : > { %1730 = vmatpush3.msra.mxu1 %v1335_v32  ;;  %v418_v32 = vadd.f32 %v2223_v4, %v396_v59  ;;  %v2864_v59 = vld [vmem:[#allocation11_spill] sm:$0xff] }
 0x16c   : > { %v1051_v33 = vpop.permute.xlu1 %1050  ;;  %1731 = vmatprep.subr.mxu1 %v1334_v10 }
 0x16d   : > { %v1102_v54 = vmul.f32 %v2377_v49, %v1051_v33  ;;  %1857 = vset.pattern.permute.xlu1 %v2842_v57  ;;  %1732 = vmatpush3.msra.mxu1 %v1334_v10 }
 0x16e   : > { %973 = vperm.xlu1 %1857, %v1871_v16   ;;  %1733 = vmatprep.subr.mxu1 %v1333_v39  ;;  %v817_v16 = vadd.f32 %v801_v58, %v2484_v53  ;;  %v906_v58 = vmul.f32 %v2349_v46, %v2864_v59 }
 0x16f   : > { %v1118_v37 = vadd.f32 %v1102_v54, %v2428_v7  ;;  %v1332_v7 = vld [vmem:[%s2801_s5 + $0x18] sm:$0xff]  ;;  %1734 = vmatpush3.msra.mxu1 %v1333_v39  ;;  %v902_v54 = vmul.f32 %v2349_v46, %v2577_v34 }
 0x170   : > { %1735 = vmatprep.subr.mxu1 %v1332_v7 }
 0x171   : > { %v1134_v52 = vmax.f32 %v1118_v37, 0.0  ;;  %v566_v13 = vpop.permute.xlu1 %565  ;;  %1736 = vmatpush3.msra.mxu1 %v1332_v7  ;;  %v1059_v37 = vpop.permute.xlu0 %1058 }
 0x172   : > { %v602_v38 = vmul.f32 %v2273_v2, %v566_v13  ;;  %1858 = vset.pattern.permute.xlu1 %v2845_v43  ;;  %1737 = vmatprep.subr.mxu1 %v1331_v17  ;;  %v1104_v13 = vmul.f32 %v2377_v49, %v1059_v37 }
 0x173   : > { %876 = vperm.xlu1 %1858, %v1872_v45   ;;  %1694 = vmatmul.mubr.f32.gmra.mxu0 %v1134_v52  ;;  %v918_v52 = vadd.f32 %v902_v54, %v817_v16  ;;  %v806_v54 = vmul.f32 %v2354_v40, %v2432_v36  ;;  %v807_v36 = vmul.f32 %v2354_v40, %v2445_v19  ;;  %v2865_v19 = vld [vmem:[#allocation15_spill] sm:$0xff] }
 0x174   : > { %v618_v48 = vadd.f32 %v602_v38, %v2533_v51  ;;  %1738 = vmatpush3.msra.mxu1 %v1331_v17  ;;  %v1329_v51 = vld [vmem:[%s2801_s5] sm:$0xff] }
 0x175   : > { %1739 = vmatprep.subr.mxu1 %v1330_v0 }
 0x176   : > { %v719_v5 = vadd.f32 %v703_v31, %v618_v48  ;;  %v2614_v12 = vpop.permute.xlu1 %759  ;;  %1740 = vmatpush3.msra.mxu1 %v1330_v0 }
 0x177   : > { %1859 = vset.pattern.permute.xlu1 %v2846_v42  ;;  %1741 = vmatprep.subr.mxu1 %v1329_v51 }
 0x178   : > { %1070 = vperm.xlu1 %1859, %v2854_v30   ;;  %v2621_v27 = vadd.f32 %v804_v28, %v719_v5  ;;  %1742 = vmatpush3.msra.mxu1 %v1329_v51  ;;  %v1873_v30 = vld [vmem:[%s1950_s30 + $0x68] sm:$0xff]  ;;  %v2863_v5 = vld [vmem:[#allocation9_spill] sm:$0xff] }
 0x179   : > { %v505_v0 = vmul.f32 %v2232_v29, %v2863_v5 }
 0x17b   : > { %v368_v56 = vpop.permute.xlu1 %367 }
 0x17c   : > { %v397_v21 = vmul.f32 %v2211_v63, %v368_v56  ;;  %1861 = vset.pattern.permute.xlu1 %v2845_v43  ;;  %v802_v56 = vmul.f32 %v2354_v40, %v2614_v12 }
 0x17d   : > { %880 = vperm.xlu1 %1861, %v1873_v30  }
 0x17e   : > { %v419_v6 = vadd.f32 %v2223_v4, %v397_v21  ;;  %v818_v35 = vadd.f32 %v802_v56, %v2545_v41  ;;  %v2866_v56 = vld [vmem:[#allocation16_spill] sm:$0xff] }
 0x180   : > { %v520_v1 = vadd.f32 %v504_v26, %v419_v6  ;;  %v570_v14 = vpop.permute.xlu1 %569 }
 0x181   : > { %v603_v9 = vmul.f32 %v2273_v2, %v570_v14  ;;  %1862 = vset.pattern.permute.xlu1 %v2850_v60 }
 0x182   : > { %783 = vperm.xlu1 %1862, %v1874_v50   ;;  %v2637_v24 = vadd.f32 %v605_v11, %v520_v1 }
 0x183   : > { %v619_v20 = vadd.f32 %v603_v9, %v2572_v47 }
 0x185   : > { %v958_v18 = vpop.permute.xlu1 %957 }
 0x186   : > { %1863 = vset.pattern.permute.xlu1 %v2842_v57  ;;  %v1003_v10 = vmul.f32 %v2364_v61, %v958_v18 }
 0x187   : > { %977 = vperm.xlu1 %1863, %v1872_v45  }
 0x188   : > { %v1019_v44 = vadd.f32 %v1003_v10, %v918_v52 }
 0x18a   : > { %v473_v33 = vpop.permute.xlu1 %472  ;;  %v1120_v31 = vadd.f32 %v1104_v13, %v1019_v44 }
 0x18b   : > { %v503_v60 = vmul.f32 %v2232_v29, %v473_v33  ;;  %981 = vperm.xlu1 %1863, %v1873_v30  }
 0x18c   : > { %v1136_v7 = vmax.f32 %v1120_v31, 0.0 }
 0x18d   : > { %v519_v47 = vadd.f32 %v503_v60, %v418_v32 }
 0x18f   : > { %1865 = vset.pattern.permute.xlu1 %v2845_v43  ;;  %v861_v39 = vpop.permute.xlu1 %860 }
 0x190   : > { %884 = vperm.xlu1 %1865, %v1874_v50   ;;  %v903_v21 = vmul.f32 %v2349_v46, %v861_v39 }
 0x192   : > { %v919_v6 = vadd.f32 %v903_v21, %v818_v35  ;;  %v809_v21 = vmul.f32 %v2354_v40, %v2456_v55  ;;  %v2713_v55 = vld [vmem:[%s2800_s4] ss:$0 sm:$0xff] }
 0x194   : > { %888 = vperm.xlu1 %1865, %v2076_v23   ;;  %v1055_v22 = vpop.permute.xlu1 %1054  ;;  %v1875_v23 = vld [vmem:[%s1950_s30 + $0x78] sm:$0xff] }
 0x195   : > { %v1103_v34 = vmul.f32 %v2377_v49, %v1055_v22 }
 0x197   : > { %v1119_v53 = vadd.f32 %v1103_v34, %v2512_v62 }
 0x198   : > { %1866 = vset.pattern.permute.xlu1 %v2846_v42 }
 0x199   : > { %v1135_v38 = vmax.f32 %v1119_v53, 0.0  ;;  %1082 = vperm.xlu1 %1866, %v1873_v30   ;;  %v671_v43 = vpop.permute.xlu1 %670 }
 0x19a   : > { %v704_v45 = vmul.f32 %v2328_v3, %v671_v43 }
 0x19b   : > { %1696 = vmatprep.mubr.f32.mxu0 %v1135_v38 }
 0x19c   : > { %v720_v28 = vadd.f32 %v704_v45, %v619_v20  ;;  %1697 = vmatmul.mubr.f32.gmra.mxu0 %v1136_v7 }
 0x19d   : > { %1868 = vset.pattern.permute.xlu1 %v2842_v57 }
 0x19e   : > { %989 = vperm.xlu1 %1868, %v1875_v23   ;;  %v865_v48 = vpop.permute.xlu1 %864 }
 0x19f   : > { %v904_v34 = vmul.f32 %v2349_v46, %v865_v48 }
 0x1a2   : > { %1869 = vset.pattern.permute.xlu1 %v2846_v42  ;;  %v1063_v42 = vpop.permute.xlu0 %1062 }
 0x1a3   : > { %1086 = vperm.xlu1 %1869, %v1874_v50   ;;  %v373_v62 = vpop.permute.xlu1 %372  ;;  %v1105_v14 = vmul.f32 %v2377_v49, %v1063_v42 }
 0x1a4   : > { %v398_v17 = vmul.f32 %v2211_v63, %v373_v62 }
 0x1a6   : > { %v420_v51 = vadd.f32 %v2223_v4, %v398_v17  ;;  %v707_v17 = vmul.f32 %v2328_v3, %v2865_v19 }
 0x1a8   : > { %v574_v8 = vpop.permute.xlu1 %573  ;;  %v521_v26 = vadd.f32 %v505_v0, %v420_v51 }
 0x1a9   : > { %v604_v57 = vmul.f32 %v2273_v2, %v574_v8  ;;  %v708_v8 = vmul.f32 %v2328_v3, %v2866_v56 }
 0x1ab   : > { %v620_v30 = vadd.f32 %v604_v57, %v519_v47 }
 0x1ad   : > { %v962_v11 = vpop.permute.xlu1 %961 }
 0x1ae   : > { %v1004_v1 = vmul.f32 %v2364_v61, %v962_v11 }
 0x1b0   : > { %v1020_v9 = vadd.f32 %v1004_v1, %v919_v6  ;;  %v1075_v6 = vpop.permute.xlu0 %1074 }
 0x1b2   : > { %v1121_v50 = vadd.f32 %v1105_v14, %v1020_v9  ;;  %v378_v20 = vpop.permute.xlu1 %377  ;;  %v1108_v9 = vmul.f32 %v2377_v49, %v1075_v6 }
 0x1b3   : > { %v399_v39 = vmul.f32 %v2211_v63, %v378_v20  ;;  %v920_v63 = vadd.f32 %v904_v34, %v2527_v15 }
 0x1b4   : > { %v1137_v12 = vmax.f32 %v1121_v50, 0.0 }
 0x1b5   : > { %v421_v44 = vadd.f32 %v2223_v4, %v399_v39 }
 0x1b6   : > { %1699 = vmatprep.mubr.f32.mxu0 %v1137_v12 }
 0x1b7   : > { %v772_v18 = vpop.permute.xlu1 %771 }
 0x1b8   : > { %v805_v25 = vmul.f32 %v2354_v40, %v772_v18 }
 0x1ba   : > { %v821_v33 = vadd.f32 %v805_v25, %v720_v28 }
 0x1bc   : > { %v966_v32 = vpop.permute.xlu1 %965  ;;  %v922_v41 = vadd.f32 %v906_v58, %v821_v33 }
 0x1bd   : > { %v1005_v38 = vmul.f32 %v2364_v61, %v966_v32 }
 0x1bf   : > { %v1021_v4 = vadd.f32 %v1005_v38, %v920_v63 }
 0x1c1   : > { %v675_v60 = vpop.permute.xlu1 %674 }
 0x1c2   : > { %v705_v47 = vmul.f32 %v2328_v3, %v675_v60 }
 0x1c4   : > { %v721_v16 = vadd.f32 %v705_v47, %v620_v30 }
 0x1c6   : > { %v869_v10 = vpop.permute.xlu1 %868  ;;  %v2678_v37 = vadd.f32 %v806_v54, %v721_v16 }
 0x1cb   : > { %v485_v52 = vpop.permute.xlu1 %484 }
 0x1cc   : > { %v506_v13 = vmul.f32 %v2232_v29, %v485_v52 }
 0x1ce   : > { %v522_v22 = vadd.f32 %v506_v13, %v421_v44 }
 0x1d0   : > { %v679_v31 = vpop.permute.xlu1 %678 }
 0x1d1   : > { %v706_v53 = vmul.f32 %v2328_v3, %v679_v31  ;;  %v1079_v31 = vpop.permute.xlu0 %1078 }
 0x1d3   : > { %v722_v43 = vadd.f32 %v706_v53, %v2637_v24 }
 0x1d5   : > { %v1067_v7 = vpop.permute.xlu1 %1066  ;;  %v2690_v45 = vadd.f32 %v807_v36, %v722_v43  ;;  %v1109_v43 = vmul.f32 %v2377_v49, %v1079_v31 }
 0x1d6   : > { %v1106_v29 = vmul.f32 %v2377_v49, %v1067_v7 }
 0x1d8   : > { %v1122_v28 = vadd.f32 %v1106_v29, %v1021_v4 }
 0x1da   : > { %v1138_v23 = vmax.f32 %v1122_v28, 0.0  ;;  %v582_v48 = vpop.permute.xlu1 %581 }
 0x1db   : > { %v606_v62 = vmul.f32 %v2273_v2, %v582_v48 }
 0x1dc   : > { %1700 = vmatmul.mubr.f32.gmra.mxu0 %v1138_v23 }
 0x1dd   : > { %v622_v5 = vadd.f32 %v606_v62, %v521_v26  ;;  %v905_v26 = vmul.f32 %v2349_v46, %v869_v10 }
 0x1df   : > { %v970_v0 = vpop.permute.xlu1 %969  ;;  %v2696_v24 = vadd.f32 %v707_v17, %v622_v5  ;;  %v921_v3 = vadd.f32 %v905_v26, %v2621_v27 }
 0x1e0   : > { %v1006_v14 = vmul.f32 %v2364_v61, %v970_v0  ;;  %v986_v0 = vpop.permute.xlu0 %985 }
 0x1e2   : > { %v1022_v12 = vadd.f32 %v1006_v14, %v921_v3 }
 0x1e4   : > { %v586_v15 = vpop.permute.xlu1 %585 }
 0x1e5   : > { %v607_v51 = vmul.f32 %v2273_v2, %v586_v15 }
 0x1e7   : > { %v623_v57 = vadd.f32 %v607_v51, %v522_v22 }
 0x1e9   : > { %v724_v30 = vadd.f32 %v708_v8, %v623_v57  ;;  %v974_v42 = vpop.permute.xlu1 %973 }
 0x1ea   : > { %v1007_v11 = vmul.f32 %v2364_v61, %v974_v42  ;;  %v1091_v42 = vpop.permute.xlu0 %1090 }
 0x1eb   : > { %v2703_v35 = vadd.f32 %v809_v21, %v724_v30 }
 0x1ec   : > { %v1023_v2 = vadd.f32 %v1007_v11, %v922_v41 }
 0x1ee   : > { %v877_v1 = vpop.permute.xlu1 %876  ;;  %v1124_v25 = vadd.f32 %v1108_v9, %v1023_v2 }
 0x1ef   : > { %v907_v44 = vmul.f32 %v2349_v46, %v877_v1  ;;  %v1112_v1 = vmul.f32 %v2377_v49, %v1091_v42 }
 0x1f0   : > { %v1140_v54 = vmax.f32 %v1124_v25, 0.0 }
 0x1f1   : > { %v923_v53 = vadd.f32 %v907_v44, %v2678_v37 }
 0x1f3   : > { %v1071_v50 = vpop.permute.xlu1 %1070  ;;  %v1689_v20 = vpop.f32.mrf.mxu0 }
 0x1f4   : > { %v1107_v18 = vmul.f32 %v2377_v49, %v1071_v50  ;;  %v1240_v59 = vadd.f32 %v1689_v20, %v2713_v55 }
 0x1f5   : > { %v1234_v58 = vpop.f32.mrf.mxu0 }
 0x1f6   : > { %v1123_v33 = vadd.f32 %v1107_v18, %v1022_v12  ;;  %v1235_v32 = vadd.f32 %v2713_v55, %v1234_v58  ;;  %v1314_v47 = vmax.f32 %v1240_v59, 0.0 }
 0x1f8   : > { %v1139_v41 = vmax.f32 %v1123_v33, 0.0  ;;  %v881_v60 = vpop.permute.xlu1 %880  ;;  %v1313_v27 = vmax.f32 %v1235_v32, 0.0 }
 0x1f9   : > { %v908_v23 = vmul.f32 %v2349_v46, %v881_v60 }
 0x1fa   : > { %1702 = vmatprep.mubr.f32.mxu0 %v1139_v41  ;;  %1743 = vmatprep.mubr.f32.mxu1 %v1313_v27 }
 0x1fb   : > { %1703 = vmatmul.mubr.f32.gmra.mxu0 %v1140_v54  ;;  %1744 = vmatmul.mubr.f32.vlgmr.msra.gmra.mxu1 %v1314_v47  ;;  %v924_v19 = vadd.f32 %v908_v23, %v2690_v45 }
 0x1fc   : > { %v1692_v16 = vpop.f32.mrf.mxu0 }
 0x1fd   : > { %v784_v10 = vpop.permute.xlu1 %783  ;;  %v1250_v39 = vadd.f32 %v1692_v16, %v2713_v55 }
 0x1fe   : > { %v1244_v52 = vpop.f32.mrf.mxu0  ;;  %v808_v17 = vmul.f32 %v2354_v40, %v784_v10  ;;  %v1010_v40 = vmul.f32 %v2364_v61, %v986_v0 }
 0x1ff   : > { %v1245_v13 = vadd.f32 %v2713_v55, %v1244_v52  ;;  %v1316_v34 = vmax.f32 %v1250_v39, 0.0  ;;  %v2746_v39 = vld [vmem:[%s2802_s6] ss:$0 sm:$0xff] }
 0x200   : > { %v824_v57 = vadd.f32 %v808_v17, %v2696_v24 }
 0x201   : > { %v1315_v22 = vmax.f32 %v1245_v13, 0.0 }
 0x202   : > { %v978_v36 = vpop.permute.xlu1 %977 }
 0x203   : > { %v1008_v38 = vmul.f32 %v2364_v61, %v978_v36  ;;  %1746 = vmatprep.mubr.f32.mxu1 %v1315_v22 }
 0x204   : > { %1747 = vmatmul.mubr.f32.gmra.mxu1 %v1316_v34 }
 0x205   : > { %v1024_v63 = vadd.f32 %v1008_v38, %v923_v53 }
 0x206   : > { %v982_v7 = vpop.permute.xlu1 %981 }
 0x207   : > { %v1125_v4 = vadd.f32 %v1109_v43, %v1024_v63  ;;  %v1009_v62 = vmul.f32 %v2364_v61, %v982_v7 }
 0x209   : > { %v1141_v29 = vmax.f32 %v1125_v4, 0.0  ;;  %v1025_v5 = vadd.f32 %v1009_v62, %v924_v19 }
 0x20b   : > { %v885_v28 = vpop.permute.xlu1 %884  ;;  %1705 = vmatprep.mubr.f32.mxu0 %v1141_v29 }
 0x20c   : > { %v909_v56 = vmul.f32 %v2349_v46, %v885_v28 }
 0x20e   : > { %v925_v26 = vadd.f32 %v909_v56, %v824_v57 }
 0x20f   : > { %v889_v48 = vpop.permute.xlu1 %888 }
 0x210   : > { %v910_v51 = vmul.f32 %v2349_v46, %v889_v48  ;;  %v1026_v2 = vadd.f32 %v1010_v40, %v925_v26 }
 0x212   : > { %v926_v11 = vadd.f32 %v910_v51, %v2703_v35 }
 0x214   : > { %v1083_v37 = vpop.permute.xlu1 %1082 }
 0x215   : > { %v1110_v15 = vmul.f32 %v2377_v49, %v1083_v37 }
 0x217   : > { %v1126_v8 = vadd.f32 %v1110_v15, %v1025_v5 }
 0x219   : > { %v1142_v21 = vmax.f32 %v1126_v8, 0.0  ;;  %v990_v30 = vpop.permute.xlu1 %989 }
 0x21a   : > { %v1011_v45 = vmul.f32 %v2364_v61, %v990_v30 }
 0x21b   : > { %1706 = vmatmul.mubr.f32.gmra.mxu0 %v1142_v21 }
 0x21c   : > { %v1027_v6 = vadd.f32 %v1011_v45, %v926_v11 }
 0x21e   : > { %v1087_v14 = vpop.permute.xlu1 %1086  ;;  %v1128_v9 = vadd.f32 %v1112_v1, %v1027_v6 }
 0x21f   : > { %v1111_v46 = vmul.f32 %v2377_v49, %v1087_v14 }
 0x220   : > { %v1144_v50 = vmax.f32 %v1128_v9, 0.0 }
 0x221   : > { %v1127_v24 = vadd.f32 %v1111_v46, %v1026_v2 }
 0x223   : > { %v1143_v3 = vmax.f32 %v1127_v24, 0.0 }
 0x225   : > { %1708 = vmatprep.mubr.f32.mxu0 %v1143_v3 }
 0x226   : > { %1709 = vmatmul.mubr.f32.gmra.mxu0 %v1144_v50 }
 0x233   : > { %v1695_v35 = vpop.f32.mrf.mxu0 }
 0x234   : > { %v1260_v20 = vadd.f32 %v1695_v35, %v2713_v55 }
 0x235   : > { %v1254_v12 = vpop.f32.mrf.mxu0 }
 0x236   : > { %v1255_v61 = vadd.f32 %v2713_v55, %v1254_v12  ;;  %v1318_v25 = vmax.f32 %v1260_v20, 0.0 }
 0x238   : > { %v1317_v18 = vmax.f32 %v1255_v61, 0.0 }
 0x23a   : > { %1749 = vmatprep.mubr.f32.mxu1 %v1317_v18 }
 0x23b   : > { %1750 = vmatmul.mubr.f32.gmra.mxu1 %v1318_v25 }
 0x25c   : > { %v1698_v59 = vpop.f32.mrf.mxu0 }
 0x25d   : > { %v1270_v58 = vadd.f32 %v1698_v59, %v2713_v55 }
 0x25e   : > { %v1264_v49 = vpop.f32.mrf.mxu0 }
 0x25f   : > { %v1265_v33 = vadd.f32 %v2713_v55, %v1264_v49  ;;  %v1320_v41 = vmax.f32 %v1270_v58, 0.0 }
 0x261   : > { %v1319_v32 = vmax.f32 %v1265_v33, 0.0 }
 0x263   : > { %1752 = vmatprep.mubr.f32.mxu1 %v1319_v32 }
 0x264   : > { %1753 = vmatmul.mubr.f32.gmra.mxu1 %v1320_v41 }
 0x29c   : > { %v1701_v60 = vpop.f32.mrf.mxu0 }
 0x29d   : > { %v1280_v27 = vadd.f32 %v1701_v60, %v2713_v55 }
 0x29e   : > { %v1274_v54 = vpop.f32.mrf.mxu0 }
 0x29f   : > { %v1275_v47 = vadd.f32 %v2713_v55, %v1274_v54  ;;  %v1322_v10 = vmax.f32 %v1280_v27, 0.0 }
 0x2a1   : > { %v1321_v16 = vmax.f32 %v1275_v47, 0.0 }
 0x2a3   : > { %1755 = vmatprep.mubr.f32.mxu1 %v1321_v16 }
 0x2a4   : > { %1756 = vmatmul.mubr.f32.gmra.mxu1 %v1322_v10 }
 0x2bb   : > { %v1704_v52 = vpop.f32.mrf.mxu0  ;;  %v1745_v44 = vpop.f32.mrf.mxu1 }
 0x2bc   : > { %v1424_v13 = vadd.f32 %v1745_v44, %v2746_v39  ;;  %v1290_v22 = vadd.f32 %v1704_v52, %v2713_v55 }
 0x2bd   : > { %v1284_v34 = vpop.f32.mrf.mxu0  ;;  %v1418_v31 = vpop.f32.mrf.mxu1 }
 0x2be   : > { %1498 = vst [vmem:[%s2753_s19 + $0x8] sm:$0xff] %v1424_v13  ;;  %v1285_v36 = vadd.f32 %v2713_v55, %v1284_v34  ;;  %v1419_v53 = vadd.f32 %v2746_v39, %v1418_v31  ;;  %v1324_v43 = vmax.f32 %v1290_v22, 0.0 }
 0x2c0   : > { %v1323_v38 = vmax.f32 %v1285_v36, 0.0  ;;  %1497 = vst [vmem:[%s2753_s19] sm:$0xff] %v1419_v53 }
 0x2c2   : > { %1758 = vmatprep.mubr.f32.mxu1 %v1323_v38 }
 0x2c3   : > { %1759 = vmatmul.mubr.f32.gmra.mxu1 %v1324_v43 }
 0x2c4   : > { %v1748_v63 = vpop.f32.mrf.mxu1 }
 0x2c5   : > { %v1434_v7 = vadd.f32 %v1748_v63, %v2746_v39 }
 0x2c6   : > { %v1428_v4 = vpop.f32.mrf.mxu1 }
 0x2c7   : > { %1500 = vst [vmem:[%s2753_s19 + $0x18] sm:$0xff] %v1434_v7  ;;  %v1429_v29 = vadd.f32 %v2746_v39, %v1428_v4 }
 0x2c9   : > { %1499 = vst [vmem:[%s2753_s19 + $0x10] sm:$0xff] %v1429_v29 }
 0x2db   : > { %v1707_v28 = vpop.f32.mrf.mxu0 }
 0x2dc   : > { %v1300_v23 = vadd.f32 %v1707_v28, %v2713_v55 }
 0x2dd   : > { %v1294_v48 = vpop.f32.mrf.mxu0 }
 0x2de   : > { %v1295_v62 = vadd.f32 %v2713_v55, %v1294_v48  ;;  %v1326_v37 = vmax.f32 %v1300_v23, 0.0 }
 0x2e0   : > { %v1325_v19 = vmax.f32 %v1295_v62, 0.0 }
 0x2e2   : > { %1761 = vmatprep.mubr.f32.mxu1 %v1325_v19 }
 0x2e3   : > { %1762 = vmatmul.mubr.f32.gmra.mxu1 %v1326_v37 }
 0x2e6   : > { %v1710_v17 = vpop.f32.mrf.mxu0 }
 0x2e7   : > { %v1310_v5 = vadd.f32 %v1710_v17, %v2713_v55 }
 0x2e8   : > { %v1304_v0 = vpop.f32.mrf.mxu0 }
 0x2e9   : > { %v1305_v15 = vadd.f32 %v2713_v55, %v1304_v0  ;;  %v1328_v56 = vmax.f32 %v1310_v5, 0.0 }
 0x2eb   : > { %v1327_v51 = vmax.f32 %v1305_v15, 0.0 }
 0x2ed   : > { %1764 = vmatprep.mubr.f32.mxu1 %v1327_v51 }
 0x2ee   : > { %1765 = vmatmul.mubr.f32.gmra.mxu1 %v1328_v56 }
 0x2fb   : > { %v1751_v8 = vpop.f32.mrf.mxu1 }
 0x2fc   : > { %v1444_v57 = vadd.f32 %v1751_v8, %v2746_v39 }
 0x2fd   : > { %v1438_v21 = vpop.f32.mrf.mxu1 }
 0x2fe   : > { %1502 = vst [vmem:[%s2753_s19 + $0x28] sm:$0xff] %v1444_v57  ;;  %v1439_v30 = vadd.f32 %v2746_v39, %v1438_v21 }
 0x300   : > { %1501 = vst [vmem:[%s2753_s19 + $0x20] sm:$0xff] %v1439_v30 }
 0x324   : > { %v1754_v42 = vpop.f32.mrf.mxu1 }
 0x325   : > { %v1454_v11 = vadd.f32 %v1754_v42, %v2746_v39 }
 0x326   : > { %v1448_v55 = vpop.f32.mrf.mxu1 }
 0x327   : > { %1504 = vst [vmem:[%s2753_s19 + $0x38] sm:$0xff] %v1454_v11  ;;  %v1449_v45 = vadd.f32 %v2746_v39, %v1448_v55 }
 0x329   : > { %1503 = vst [vmem:[%s2753_s19 + $0x30] sm:$0xff] %v1449_v45 }
 0x364   : > { %v1757_v26 = vpop.f32.mrf.mxu1 }
 0x365   : > { %v1464_v40 = vadd.f32 %v1757_v26, %v2746_v39 }
 0x366   : > { %v1458_v6 = vpop.f32.mrf.mxu1 }
 0x367   : > { %1506 = vst [vmem:[%s2753_s19 + $0x48] sm:$0xff] %v1464_v40  ;;  %v1459_v1 = vadd.f32 %v2746_v39, %v1458_v6 }
 0x369   : > { %1505 = vst [vmem:[%s2753_s19 + $0x40] sm:$0xff] %v1459_v1 }
 0x383   : > { %v1760_v14 = vpop.f32.mrf.mxu1 }
 0x384   : > { %v1474_v2 = vadd.f32 %v1760_v14, %v2746_v39 }
 0x385   : > { %v1468_v46 = vpop.f32.mrf.mxu1 }
 0x386   : > { %1508 = vst [vmem:[%s2753_s19 + $0x58] sm:$0xff] %v1474_v2  ;;  %v1469_v9 = vadd.f32 %v2746_v39, %v1468_v46 }
 0x388   : > { %1507 = vst [vmem:[%s2753_s19 + $0x50] sm:$0xff] %v1469_v9 }
 0x3a3   : > { %v1763_v24 = vpop.f32.mrf.mxu1 }
 0x3a4   : > { %v1484_v3 = vadd.f32 %v1763_v24, %v2746_v39 }
 0x3a5   : > { %v1478_v50 = vpop.f32.mrf.mxu1 }
 0x3a6   : > { %1510 = vst [vmem:[%s2753_s19 + $0x68] sm:$0xff] %v1484_v3  ;;  %v1479_v35 = vadd.f32 %v2746_v39, %v1478_v50 }
 0x3a8   : > { %1509 = vst [vmem:[%s2753_s19 + $0x60] sm:$0xff] %v1479_v35 }
 0x3ae   : > { %v1766_v20 = vpop.f32.mrf.mxu1 }
 0x3af   : > { %v1494_v12 = vadd.f32 %v1766_v20, %v2746_v39 }
 0x3b0   : > { %v1488_v61 = vpop.f32.mrf.mxu1 }
 0x3b1   : > { %1512 = vst [vmem:[%s2753_s19 + $0x78] sm:$0xff] %v1494_v12  ;;  %v1489_v18 = vadd.f32 %v2746_v39, %v1488_v61 }
 0x3b3   : > { %1511 = vst [vmem:[%s2753_s19 + $0x70] sm:$0xff] %v1489_v18 }
 0x3b4 PF: > { %s17_s24 = sadd.s32 1, %s1882_s24  }
 0x3b5   : > { %p14_p4 = scmp.ge.s32.totalorder %s17_s24, 4  }
 0x3b7   :  { %16 = sbr.rel (!%p14_p4) target bundleno = 1 (0x1), region = 78 }

</bundles_post_ra>
